<compile_context>
chip_gen: v5e
topology: v5e:2x2
jax: 0.10.0
libtpu: 0.0.40
codegen_flags: <defaults>
</compile_context>

<pallas_src>
import math

import jax
import jax.numpy as jnp
from jax.experimental import pallas as pl
from jax.experimental.pallas import tpu as pltpu

# ----------------------------- config --------------------------------------
VOCAB = 64
TYPE_VOCAB = 2
MAX_POS = 30          # matches max_seq_length=30 in the PyTorch module
BATCH = 2
SEQ = 8
HIDDEN = 32
NUM_HEADS = 4
HEAD_DIM = HIDDEN // NUM_HEADS
INTERMEDIATE = 64
NUM_LAYERS = 2
LN_EPS = 1e-12        # BERT LayerNorm eps

VMEM = pltpu.MemorySpace.VMEM

# packed small-parameter slab layout: vec[L+1, 8, 128] f32
#   slab 0      : row 0 = emb LN gamma, row 1 = emb LN beta
#   slab 1 + l  : row 0 = bqkv (3H), row 1 = bo (H), row 2/3 = ln1 gamma/beta,
#                 row 4 = bi (I), row 5 = bo2 (H), row 6/7 = ln2 gamma/beta
PACK_ROWS = 8
PACK_LANES = 128


# --------------------------- kernel helpers ----------------------------------
def _layernorm(x, gamma, beta):
    # one-pass mean / variance (sum and sum-of-squares): the two cross-lane
    # reductions are independent instead of serially dependent.
    n = x.shape[-1]
    s1 = jnp.sum(x, axis=-1, keepdims=True)
    s2 = jnp.sum(x * x, axis=-1, keepdims=True)
    mean = s1 * (1.0 / n)
    var = s2 * (1.0 / n) - mean * mean
    return (x - mean) * jax.lax.rsqrt(var + LN_EPS) * gamma + beta


def _gelu(x):
    # TODO(synk): original BERT uses erf-based GELU; tanh approximation used
    # here for guaranteed TPU lowering (numerically near-identical, ~1e-3).
    c = math.sqrt(2.0 / math.pi)
    return 0.5 * x * (1.0 + jnp.tanh(c * (x + 0.044715 * x * x * x)))


# ------------------------------ Pallas kernel --------------------------------
def bert_encoder_kernel(emb_ref, mask_ref, vec_ref,
                        wqkv_ref, wo_ref, wi_ref, wo2_ref,
                        o_ref):
    """Whole BERT encoder (emb LN + L layers) in one kernel; emits [CLS] rows.

    emb_ref : [B*S, H]        f32   summed word+pos+type embeddings (flattened)
    mask_ref: [B, 1, S]       f32   additive mask bias (0 or -10000)
    vec_ref : [L+1, 8, 128]   f32   packed biases / LN params (layout above)
    wqkv/wo/wi/wo2 : [L, ...] bf16  matmul weights, stored [in, out]
    o_ref   : [B, H]          f32   [CLS] embeddings
    """
    B, _, S = mask_ref.shape
    T, H = emb_ref.shape               # T = B * S
    L = wqkv_ref.shape[0]
    nh = NUM_HEADS
    hd = H // nh
    I = wi_ref.shape[2]
    scale = 1.0 / math.sqrt(hd)

    # head-batched additive mask: [nh*B, 1, S], group index g = head*B + b
    mask_bias = mask_ref[...]                                   # [B, 1, S]
    mask_g = jnp.concatenate([mask_bias] * nh, axis=0)          # [nh*B, 1, S]

    # ---- embedding LayerNorm (fused into the same kernel) ----
    emb_slab = vec_ref[0]                                       # [8, 128]
    h = _layernorm(emb_ref[...], emb_slab[0:1, 0:H], emb_slab[1:2, 0:H])  # [T,H]

    # ---- encoder layers (short static loop; weights indexed on leading axis)
    for l in range(L):
        slab = vec_ref[l + 1]                                   # [8, 128]

        # fused QKV projection: one [T, H] @ [H, 3H] bf16 MXU matmul
        qkv = jnp.dot(h.astype(jnp.bfloat16), wqkv_ref[l],
                      preferred_element_type=jnp.float32) + slab[0:1, 0:3 * H]

        # regroup to head-batched [G = nh*B, S, hd] using static lane slices +
        # leading-axis concat only (no lane-splitting reshapes).
        def heads(off):
            return jnp.concatenate(
                [qkv[:, off + hh * hd: off + (hh + 1) * hd].reshape(B, S, hd)
                 for hh in range(nh)],
                axis=0)

        qh = heads(0)            # [G, S, hd]
        kh = heads(H)
        vh = heads(2 * H)

        # ONE batched score einsum + ONE batched softmax + ONE batched context
        s = jnp.einsum('gqd,gkd->gqk', qh, kh,
                       preferred_element_type=jnp.float32) * scale   # [G, S, S]
        s = s + mask_g
        s = s - jnp.max(s, axis=-1, keepdims=True)
        p = jnp.exp(s)
        p = p * pl.reciprocal(jnp.sum(p, axis=-1, keepdims=True), approx=True)
        ctx_g = jnp.einsum('gqk,gkd->gqd', p, vh,
                           preferred_element_type=jnp.float32)        # [G, S, hd]

        # regroup back to [T, H]: heads return to the lane axis
        ctx = jnp.concatenate(
            [ctx_g[hh * B:(hh + 1) * B].reshape(T, hd) for hh in range(nh)],
            axis=-1)                                                  # [T, H]

        # attention output projection: one [T, H] @ [H, H] bf16 matmul
        attn = jnp.dot(ctx.astype(jnp.bfloat16), wo_ref[l],
                       preferred_element_type=jnp.float32) + slab[1:2, 0:H]

        # add & norm 1
        h1 = _layernorm(attn + h, slab[2:3, 0:H], slab[3:4, 0:H])

        # feed-forward: [T, H] @ [H, I] and [T, I] @ [I, H], GELU in f32
        inter = jnp.dot(h1.astype(jnp.bfloat16), wi_ref[l],
                        preferred_element_type=jnp.float32) + slab[4:5, 0:I]
        inter = _gelu(inter)
        ffn = jnp.dot(inter.astype(jnp.bfloat16), wo2_ref[l],
                      preferred_element_type=jnp.float32) + slab[5:6, 0:H]

        # add & norm 2
        h = _layernorm(ffn + h1, slab[6:7, 0:H], slab[7:8, 0:H])

    # ---- emit only the [CLS] rows -> [B, H] (single aligned slice, no gather)
    # TODO(synk): if the output ever grows beyond this slab, pad the last dim
    # to a multiple of 128 to avoid masked partial stores at scale.
    o_ref[...] = h.reshape(B, S, H)[:, 0, :]


# ------------------------------ wrapper ---------------------------------------
def bert_encoder_pallas(emb_flat, mask_bias, vec_pack, wqkv, wo, wi, wo2):
    args = (emb_flat, mask_bias, vec_pack, wqkv, wo, wi, wo2)
    return pl.pallas_call(
        bert_encoder_kernel,
        out_shape=jax.ShapeDtypeStruct((BATCH, HIDDEN), jnp.float32),
        in_specs=[pl.BlockSpec(memory_space=VMEM)] * len(args),
        out_specs=pl.BlockSpec(memory_space=VMEM),
    )(*args)


# --------------------------- parameter setup ---------------------------------
def init_params(key):
    std = 0.02
    ks = iter(jax.random.split(key, 4 + NUM_LAYERS * 8))

    def normal(shape):
        return (std * jax.random.normal(next(ks), shape)).astype(jnp.float32)

    params = {
        'word_emb': normal((VOCAB, HIDDEN)),
        'pos_emb': normal((MAX_POS, HIDDEN)),
        'type_emb': normal((TYPE_VOCAB, HIDDEN)),
    }

    # packed small-parameter slab: biases/betas zero, LN gammas one.
    vec = jnp.zeros((NUM_LAYERS + 1, PACK_ROWS, PACK_LANES), jnp.float32)
    vec = vec.at[0, 0, :HIDDEN].set(1.0)          # embedding LN gamma
    for l in range(NUM_LAYERS):
        vec = vec.at[l + 1, 2, :HIDDEN].set(1.0)  # ln1 gamma
        vec = vec.at[l + 1, 6, :HIDDEN].set(1.0)  # ln2 gamma
    params['vec'] = vec

    # NOTE: weights stored [in, out] and applied as x @ W.  A real PyTorch
    # nn.Linear checkpoint ([out, in]) must be transposed when imported.
    wqkv_l, wo_l, wi_l, wo2_l = [], [], [], []
    for _ in range(NUM_LAYERS):
        wq = normal((HIDDEN, HIDDEN))
        wk = normal((HIDDEN, HIDDEN))
        wv = normal((HIDDEN, HIDDEN))
        wqkv_l.append(jnp.concatenate([wq, wk, wv], axis=1))   # [H, 3H]
        wo_l.append(normal((HIDDEN, HIDDEN)))
        wi_l.append(normal((HIDDEN, INTERMEDIATE)))
        wo2_l.append(normal((INTERMEDIATE, HIDDEN)))

    # matmul weights in bf16 (MXU-native); packed vector params stay f32
    params['wqkv'] = jnp.stack(wqkv_l).astype(jnp.bfloat16)    # [L, H, 3H]
    params['wo'] = jnp.stack(wo_l).astype(jnp.bfloat16)        # [L, H, H]
    params['wi'] = jnp.stack(wi_l).astype(jnp.bfloat16)        # [L, H, I]
    params['wo2'] = jnp.stack(wo2_l).astype(jnp.bfloat16)      # [L, I, H]
    return params


# ----------------------------- full forward ----------------------------------
@jax.jit
def bert_feature_forward(params, input_ids, segment_ids, input_mask):
    """Equivalent of bert_model.bert(input_ids, segment_ids, input_mask)[0][:, 0]."""
    B, S = input_ids.shape
    # --- embeddings (gathers are glue; LayerNorm is fused into the kernel) ---
    words = jnp.take(params['word_emb'], input_ids, axis=0)          # [B,S,H]
    pos = params['pos_emb'][:S][None, :, :]                          # [1,S,H]
    types = jnp.take(params['type_emb'], segment_ids, axis=0)        # [B,S,H]
    emb = (words + pos + types).astype(jnp.float32).reshape(B * S, HIDDEN)

    # --- extended attention mask: (1 - mask) * -10000, broadcast over queries
    mask_bias = ((1.0 - input_mask.astype(jnp.float32)) * -10000.0)[:, None, :]

    # --- single fused Pallas kernel: emb LN + all encoder layers + [CLS] pick
    return bert_encoder_pallas(emb, mask_bias, params['vec'],
                               params['wqkv'], params['wo'],
                               params['wi'], params['wo2'])           # [B, H]


# --------------------------------- main ---------------------------------------
if __name__ == "__main__":
    key = jax.random.PRNGKey(0)
    kp, kid = jax.random.split(key)
    params = init_params(kp)

    # synthetic tokenized inputs (as convert_examples_to_features would build):
    # real tokens followed by zero-padding, segment ids all 0, mask 1 on tokens.
    input_ids = jax.random.randint(kid, (BATCH, SEQ), 1, VOCAB, dtype=jnp.int32)
    lengths = jnp.array([SEQ, SEQ - 3], dtype=jnp.int32)
    pos_idx = jnp.arange(SEQ)[None, :]
    input_mask = (pos_idx < lengths[:, None]).astype(jnp.int32)
    input_ids = input_ids * input_mask                 # pad ids -> 0
    segment_ids = jnp.zeros((BATCH, SEQ), jnp.int32)

    out = bert_feature_forward(params, input_ids, segment_ids, input_mask)
    jax.block_until_ready(out)
    assert out.shape == (BATCH, HIDDEN)
    print("KERNEL_OK")
</pallas_src>

<mosaic_0001>
module attributes {stable_mosaic.version = 11 : i64} {
  func.func @bert_encoder_kernel(%arg0: memref<16x32xf32, #tpu.memory_space<vmem>>, %arg1: memref<2x1x8xf32, #tpu.memory_space<vmem>>, %arg2: memref<3x8x128xf32, #tpu.memory_space<vmem>>, %arg3: memref<2x32x96xbf16, #tpu.memory_space<vmem>>, %arg4: memref<2x32x32xbf16, #tpu.memory_space<vmem>>, %arg5: memref<2x32x64xbf16, #tpu.memory_space<vmem>>, %arg6: memref<2x64x32xbf16, #tpu.memory_space<vmem>>, %arg7: memref<2x32xf32, #tpu.memory_space<vmem>>) attributes {dimension_semantics = [], scalar_prefetch = 0 : i64, scratch_operands = 0 : i64, tpu.core_type = #tpu.core_type<tc>} {
    %c0 = arith.constant 0 : index
    %c0_0 = arith.constant 0 : index
    %c0_1 = arith.constant 0 : index
    %0 = vector.load %arg1[%c0, %c0_0, %c0_1] : memref<2x1x8xf32, #tpu.memory_space<vmem>>, vector<2x1x8xf32>
    %1 = tpu.concatenate %0, %0, %0, %0 in 0 : vector<2x1x8xf32>, vector<2x1x8xf32>, vector<2x1x8xf32>, vector<2x1x8xf32> -> vector<8x1x8xf32>
    %c0_2 = arith.constant 0 : index
    %c0_3 = arith.constant 0 : index
    %c0_4 = arith.constant 0 : index
    %2 = vector.load %arg2[%c0_2, %c0_3, %c0_4] : memref<3x8x128xf32, #tpu.memory_space<vmem>>, vector<1x8x128xf32>
    %3 = vector.shape_cast %2 : vector<1x8x128xf32> to vector<8x128xf32>
    %c0_5 = arith.constant 0 : index
    %c0_6 = arith.constant 0 : index
    %4 = vector.load %arg0[%c0_5, %c0_6] : memref<16x32xf32, #tpu.memory_space<vmem>>, vector<16x32xf32>
    %5 = vector.extract_strided_slice %3 {offsets = [0, 0], sizes = [1, 32], strides = [1, 1]} : vector<8x128xf32> to vector<1x32xf32>
    %6 = vector.extract_strided_slice %3 {offsets = [1, 0], sizes = [1, 32], strides = [1, 1]} : vector<8x128xf32> to vector<1x32xf32>
    %cst = arith.constant dense<0.000000e+00> : vector<16xf32>
    %7 = vector.multi_reduction <add>, %4, %cst [1] : vector<16x32xf32> to vector<16xf32>
    %8 = vector.shape_cast %7 : vector<16xf32> to vector<16x1xf32>
    %9 = arith.mulf %4, %4 : vector<16x32xf32>
    %cst_7 = arith.constant dense<0.000000e+00> : vector<16xf32>
    %10 = vector.multi_reduction <add>, %9, %cst_7 [1] : vector<16x32xf32> to vector<16xf32>
    %11 = vector.shape_cast %10 : vector<16xf32> to vector<16x1xf32>
    %cst_8 = arith.constant 3.125000e-02 : f32
    %12 = vector.broadcast %cst_8 : f32 to vector<16x1xf32>
    %13 = arith.mulf %8, %12 : vector<16x1xf32>
    %cst_9 = arith.constant 3.125000e-02 : f32
    %14 = vector.broadcast %cst_9 : f32 to vector<16x1xf32>
    %15 = arith.mulf %11, %14 : vector<16x1xf32>
    %16 = arith.mulf %13, %13 : vector<16x1xf32>
    %17 = arith.subf %15, %16 : vector<16x1xf32>
    %18 = vector.broadcast %13 : vector<16x1xf32> to vector<16x32xf32>
    %19 = arith.subf %4, %18 : vector<16x32xf32>
    %cst_10 = arith.constant 9.99999996E-13 : f32
    %20 = vector.broadcast %cst_10 : f32 to vector<16x1xf32>
    %21 = arith.addf %17, %20 : vector<16x1xf32>
    %22 = math.rsqrt %21 : vector<16x1xf32>
    %23 = vector.broadcast %22 : vector<16x1xf32> to vector<16x32xf32>
    %24 = arith.mulf %19, %23 : vector<16x32xf32>
    %25 = vector.broadcast %5 : vector<1x32xf32> to vector<16x32xf32>
    %26 = arith.mulf %24, %25 : vector<16x32xf32>
    %27 = vector.broadcast %6 : vector<1x32xf32> to vector<16x32xf32>
    %28 = arith.addf %26, %27 : vector<16x32xf32>
    %c1 = arith.constant 1 : index
    %c0_11 = arith.constant 0 : index
    %c0_12 = arith.constant 0 : index
    %29 = vector.load %arg2[%c1, %c0_11, %c0_12] : memref<3x8x128xf32, #tpu.memory_space<vmem>>, vector<1x8x128xf32>
    %30 = vector.shape_cast %29 : vector<1x8x128xf32> to vector<8x128xf32>
    %31 = arith.truncf %28 : vector<16x32xf32> to vector<16x32xbf16>
    %c0_13 = arith.constant 0 : index
    %c0_14 = arith.constant 0 : index
    %c0_15 = arith.constant 0 : index
    %32 = vector.load %arg3[%c0_13, %c0_14, %c0_15] : memref<2x32x96xbf16, #tpu.memory_space<vmem>>, vector<1x32x96xbf16>
    %33 = vector.shape_cast %32 : vector<1x32x96xbf16> to vector<32x96xbf16>
    %cst_16 = arith.constant dense<0.000000e+00> : vector<16x96xf32>
    %34 = tpu.matmul %31, %33, %cst_16 {dimension_numbers = #tpu.dot_dimension_numbers<[1], [0], [0], [1], [0, 0, 1, 1], [], []>} : vector<16x32xbf16>, vector<32x96xbf16>, vector<16x96xf32> -> vector<16x96xf32>
    %35 = vector.extract_strided_slice %30 {offsets = [0, 0], sizes = [1, 96], strides = [1, 1]} : vector<8x128xf32> to vector<1x96xf32>
    %36 = vector.broadcast %35 : vector<1x96xf32> to vector<16x96xf32>
    %37 = arith.addf %34, %36 : vector<16x96xf32>
    %38 = vector.extract_strided_slice %37 {offsets = [0, 0], sizes = [16, 8], strides = [1, 1]} : vector<16x96xf32> to vector<16x8xf32>
    %39 = vector.shape_cast %38 : vector<16x8xf32> to vector<2x8x8xf32>
    %40 = vector.extract_strided_slice %37 {offsets = [0, 8], sizes = [16, 8], strides = [1, 1]} : vector<16x96xf32> to vector<16x8xf32>
    %41 = vector.shape_cast %40 : vector<16x8xf32> to vector<2x8x8xf32>
    %42 = vector.extract_strided_slice %37 {offsets = [0, 16], sizes = [16, 8], strides = [1, 1]} : vector<16x96xf32> to vector<16x8xf32>
    %43 = vector.shape_cast %42 : vector<16x8xf32> to vector<2x8x8xf32>
    %44 = vector.extract_strided_slice %37 {offsets = [0, 24], sizes = [16, 8], strides = [1, 1]} : vector<16x96xf32> to vector<16x8xf32>
    %45 = vector.shape_cast %44 : vector<16x8xf32> to vector<2x8x8xf32>
    %46 = tpu.concatenate %39, %41, %43, %45 in 0 : vector<2x8x8xf32>, vector<2x8x8xf32>, vector<2x8x8xf32>, vector<2x8x8xf32> -> vector<8x8x8xf32>
    %47 = vector.extract_strided_slice %37 {offsets = [0, 32], sizes = [16, 8], strides = [1, 1]} : vector<16x96xf32> to vector<16x8xf32>
    %48 = vector.shape_cast %47 : vector<16x8xf32> to vector<2x8x8xf32>
    %49 = vector.extract_strided_slice %37 {offsets = [0, 40], sizes = [16, 8], strides = [1, 1]} : vector<16x96xf32> to vector<16x8xf32>
    %50 = vector.shape_cast %49 : vector<16x8xf32> to vector<2x8x8xf32>
    %51 = vector.extract_strided_slice %37 {offsets = [0, 48], sizes = [16, 8], strides = [1, 1]} : vector<16x96xf32> to vector<16x8xf32>
    %52 = vector.shape_cast %51 : vector<16x8xf32> to vector<2x8x8xf32>
    %53 = vector.extract_strided_slice %37 {offsets = [0, 56], sizes = [16, 8], strides = [1, 1]} : vector<16x96xf32> to vector<16x8xf32>
    %54 = vector.shape_cast %53 : vector<16x8xf32> to vector<2x8x8xf32>
    %55 = tpu.concatenate %48, %50, %52, %54 in 0 : vector<2x8x8xf32>, vector<2x8x8xf32>, vector<2x8x8xf32>, vector<2x8x8xf32> -> vector<8x8x8xf32>
    %56 = vector.extract_strided_slice %37 {offsets = [0, 64], sizes = [16, 8], strides = [1, 1]} : vector<16x96xf32> to vector<16x8xf32>
    %57 = vector.shape_cast %56 : vector<16x8xf32> to vector<2x8x8xf32>
    %58 = vector.extract_strided_slice %37 {offsets = [0, 72], sizes = [16, 8], strides = [1, 1]} : vector<16x96xf32> to vector<16x8xf32>
    %59 = vector.shape_cast %58 : vector<16x8xf32> to vector<2x8x8xf32>
    %60 = vector.extract_strided_slice %37 {offsets = [0, 80], sizes = [16, 8], strides = [1, 1]} : vector<16x96xf32> to vector<16x8xf32>
    %61 = vector.shape_cast %60 : vector<16x8xf32> to vector<2x8x8xf32>
    %62 = vector.extract_strided_slice %37 {offsets = [0, 88], sizes = [16, 8], strides = [1, 1]} : vector<16x96xf32> to vector<16x8xf32>
    %63 = vector.shape_cast %62 : vector<16x8xf32> to vector<2x8x8xf32>
    %64 = tpu.concatenate %57, %59, %61, %63 in 0 : vector<2x8x8xf32>, vector<2x8x8xf32>, vector<2x8x8xf32>, vector<2x8x8xf32> -> vector<8x8x8xf32>
    "tpu.trace_start"() <{level = 10 : i32, message = "gqd,gkd->gqk"}> : () -> ()
    %cst_17 = arith.constant dense<0.000000e+00> : vector<8x8x8xf32>
    %65 = tpu.matmul %46, %55, %cst_17 {dimension_numbers = #tpu.dot_dimension_numbers<[2], [2], [1], [1], [0, 0, 0, 1, 1, 1], [0], [0]>} : vector<8x8x8xf32>, vector<8x8x8xf32>, vector<8x8x8xf32> -> vector<8x8x8xf32>
    "tpu.trace_stop"() : () -> ()
    %cst_18 = arith.constant 0.353553385 : f32
    %66 = vector.broadcast %cst_18 : f32 to vector<8x8x8xf32>
    %67 = arith.mulf %65, %66 : vector<8x8x8xf32>
    %68 = vector.broadcast %1 : vector<8x1x8xf32> to vector<8x8x8xf32>
    %69 = arith.addf %67, %68 : vector<8x8x8xf32>
    %cst_19 = arith.constant dense<0xFF800000> : vector<8x8xf32>
    %70 = vector.multi_reduction <maximumf>, %69, %cst_19 [2] : vector<8x8x8xf32> to vector<8x8xf32>
    %71 = vector.shape_cast %70 : vector<8x8xf32> to vector<8x8x1xf32>
    %72 = vector.broadcast %71 : vector<8x8x1xf32> to vector<8x8x8xf32>
    %73 = arith.subf %69, %72 : vector<8x8x8xf32>
    %74 = math.exp %73 : vector<8x8x8xf32>
    %cst_20 = arith.constant dense<0.000000e+00> : vector<8x8xf32>
    %75 = vector.multi_reduction <add>, %74, %cst_20 [2] : vector<8x8x8xf32> to vector<8x8xf32>
    %76 = vector.shape_cast %75 : vector<8x8xf32> to vector<8x8x1xf32>
    %77 = tpu.reciprocal %76 {approx = true} : vector<8x8x1xf32> -> vector<8x8x1xf32>
    %78 = vector.broadcast %77 : vector<8x8x1xf32> to vector<8x8x8xf32>
    %79 = arith.mulf %74, %78 : vector<8x8x8xf32>
    "tpu.trace_start"() <{level = 10 : i32, message = "gqk,gkd->gqd"}> : () -> ()
    %cst_21 = arith.constant dense<0.000000e+00> : vector<8x8x8xf32>
    %80 = tpu.matmul %79, %64, %cst_21 {dimension_numbers = #tpu.dot_dimension_numbers<[2], [1], [1], [2], [0, 0, 0, 1, 1, 2], [0], [0]>} : vector<8x8x8xf32>, vector<8x8x8xf32>, vector<8x8x8xf32> -> vector<8x8x8xf32>
    "tpu.trace_stop"() : () -> ()
    %81 = vector.extract_strided_slice %80 {offsets = [0, 0, 0], sizes = [2, 8, 8], strides = [1, 1, 1]} : vector<8x8x8xf32> to vector<2x8x8xf32>
    %82 = vector.shape_cast %81 : vector<2x8x8xf32> to vector<16x8xf32>
    %83 = vector.extract_strided_slice %80 {offsets = [2, 0, 0], sizes = [2, 8, 8], strides = [1, 1, 1]} : vector<8x8x8xf32> to vector<2x8x8xf32>
    %84 = vector.shape_cast %83 : vector<2x8x8xf32> to vector<16x8xf32>
    %85 = vector.extract_strided_slice %80 {offsets = [4, 0, 0], sizes = [2, 8, 8], strides = [1, 1, 1]} : vector<8x8x8xf32> to vector<2x8x8xf32>
    %86 = vector.shape_cast %85 : vector<2x8x8xf32> to vector<16x8xf32>
    %87 = vector.extract_strided_slice %80 {offsets = [6, 0, 0], sizes = [2, 8, 8], strides = [1, 1, 1]} : vector<8x8x8xf32> to vector<2x8x8xf32>
    %88 = vector.shape_cast %87 : vector<2x8x8xf32> to vector<16x8xf32>
    %89 = tpu.concatenate %82, %84, %86, %88 in 1 : vector<16x8xf32>, vector<16x8xf32>, vector<16x8xf32>, vector<16x8xf32> -> vector<16x32xf32>
    %90 = arith.truncf %89 : vector<16x32xf32> to vector<16x32xbf16>
    %c0_22 = arith.constant 0 : index
    %c0_23 = arith.constant 0 : index
    %c0_24 = arith.constant 0 : index
    %91 = vector.load %arg4[%c0_22, %c0_23, %c0_24] : memref<2x32x32xbf16, #tpu.memory_space<vmem>>, vector<1x32x32xbf16>
    %92 = vector.shape_cast %91 : vector<1x32x32xbf16> to vector<32x32xbf16>
    %cst_25 = arith.constant dense<0.000000e+00> : vector<16x32xf32>
    %93 = tpu.matmul %90, %92, %cst_25 {dimension_numbers = #tpu.dot_dimension_numbers<[1], [0], [0], [1], [0, 0, 1, 1], [], []>} : vector<16x32xbf16>, vector<32x32xbf16>, vector<16x32xf32> -> vector<16x32xf32>
    %94 = vector.extract_strided_slice %30 {offsets = [1, 0], sizes = [1, 32], strides = [1, 1]} : vector<8x128xf32> to vector<1x32xf32>
    %95 = vector.broadcast %94 : vector<1x32xf32> to vector<16x32xf32>
    %96 = arith.addf %93, %95 : vector<16x32xf32>
    %97 = arith.addf %96, %28 : vector<16x32xf32>
    %98 = vector.extract_strided_slice %30 {offsets = [2, 0], sizes = [1, 32], strides = [1, 1]} : vector<8x128xf32> to vector<1x32xf32>
    %99 = vector.extract_strided_slice %30 {offsets = [3, 0], sizes = [1, 32], strides = [1, 1]} : vector<8x128xf32> to vector<1x32xf32>
    %cst_26 = arith.constant dense<0.000000e+00> : vector<16xf32>
    %100 = vector.multi_reduction <add>, %97, %cst_26 [1] : vector<16x32xf32> to vector<16xf32>
    %101 = vector.shape_cast %100 : vector<16xf32> to vector<16x1xf32>
    %102 = arith.mulf %97, %97 : vector<16x32xf32>
    %cst_27 = arith.constant dense<0.000000e+00> : vector<16xf32>
    %103 = vector.multi_reduction <add>, %102, %cst_27 [1] : vector<16x32xf32> to vector<16xf32>
    %104 = vector.shape_cast %103 : vector<16xf32> to vector<16x1xf32>
    %cst_28 = arith.constant 3.125000e-02 : f32
    %105 = vector.broadcast %cst_28 : f32 to vector<16x1xf32>
    %106 = arith.mulf %101, %105 : vector<16x1xf32>
    %cst_29 = arith.constant 3.125000e-02 : f32
    %107 = vector.broadcast %cst_29 : f32 to vector<16x1xf32>
    %108 = arith.mulf %104, %107 : vector<16x1xf32>
    %109 = arith.mulf %106, %106 : vector<16x1xf32>
    %110 = arith.subf %108, %109 : vector<16x1xf32>
    %111 = vector.broadcast %106 : vector<16x1xf32> to vector<16x32xf32>
    %112 = arith.subf %97, %111 : vector<16x32xf32>
    %cst_30 = arith.constant 9.99999996E-13 : f32
    %113 = vector.broadcast %cst_30 : f32 to vector<16x1xf32>
    %114 = arith.addf %110, %113 : vector<16x1xf32>
    %115 = math.rsqrt %114 : vector<16x1xf32>
    %116 = vector.broadcast %115 : vector<16x1xf32> to vector<16x32xf32>
    %117 = arith.mulf %112, %116 : vector<16x32xf32>
    %118 = vector.broadcast %98 : vector<1x32xf32> to vector<16x32xf32>
    %119 = arith.mulf %117, %118 : vector<16x32xf32>
    %120 = vector.broadcast %99 : vector<1x32xf32> to vector<16x32xf32>
    %121 = arith.addf %119, %120 : vector<16x32xf32>
    %122 = arith.truncf %121 : vector<16x32xf32> to vector<16x32xbf16>
    %c0_31 = arith.constant 0 : index
    %c0_32 = arith.constant 0 : index
    %c0_33 = arith.constant 0 : index
    %123 = vector.load %arg5[%c0_31, %c0_32, %c0_33] : memref<2x32x64xbf16, #tpu.memory_space<vmem>>, vector<1x32x64xbf16>
    %124 = vector.shape_cast %123 : vector<1x32x64xbf16> to vector<32x64xbf16>
    %cst_34 = arith.constant dense<0.000000e+00> : vector<16x64xf32>
    %125 = tpu.matmul %122, %124, %cst_34 {dimension_numbers = #tpu.dot_dimension_numbers<[1], [0], [0], [1], [0, 0, 1, 1], [], []>} : vector<16x32xbf16>, vector<32x64xbf16>, vector<16x64xf32> -> vector<16x64xf32>
    %126 = vector.extract_strided_slice %30 {offsets = [4, 0], sizes = [1, 64], strides = [1, 1]} : vector<8x128xf32> to vector<1x64xf32>
    %127 = vector.broadcast %126 : vector<1x64xf32> to vector<16x64xf32>
    %128 = arith.addf %125, %127 : vector<16x64xf32>
    %cst_35 = arith.constant 5.000000e-01 : f32
    %129 = vector.broadcast %cst_35 : f32 to vector<16x64xf32>
    %130 = arith.mulf %129, %128 : vector<16x64xf32>
    %cst_36 = arith.constant 4.471500e-02 : f32
    %131 = vector.broadcast %cst_36 : f32 to vector<16x64xf32>
    %132 = arith.mulf %131, %128 : vector<16x64xf32>
    %133 = arith.mulf %132, %128 : vector<16x64xf32>
    %134 = arith.mulf %133, %128 : vector<16x64xf32>
    %135 = arith.addf %128, %134 : vector<16x64xf32>
    %cst_37 = arith.constant 0.797884583 : f32
    %136 = vector.broadcast %cst_37 : f32 to vector<16x64xf32>
    %137 = arith.mulf %136, %135 : vector<16x64xf32>
    %138 = math.tanh %137 : vector<16x64xf32>
    %cst_38 = arith.constant 1.000000e+00 : f32
    %139 = vector.broadcast %cst_38 : f32 to vector<16x64xf32>
    %140 = arith.addf %139, %138 : vector<16x64xf32>
    %141 = arith.mulf %130, %140 : vector<16x64xf32>
    %142 = arith.truncf %141 : vector<16x64xf32> to vector<16x64xbf16>
    %c0_39 = arith.constant 0 : index
    %c0_40 = arith.constant 0 : index
    %c0_41 = arith.constant 0 : index
    %143 = vector.load %arg6[%c0_39, %c0_40, %c0_41] : memref<2x64x32xbf16, #tpu.memory_space<vmem>>, vector<1x64x32xbf16>
    %144 = vector.shape_cast %143 : vector<1x64x32xbf16> to vector<64x32xbf16>
    %cst_42 = arith.constant dense<0.000000e+00> : vector<16x32xf32>
    %145 = tpu.matmul %142, %144, %cst_42 {dimension_numbers = #tpu.dot_dimension_numbers<[1], [0], [0], [1], [0, 0, 1, 1], [], []>} : vector<16x64xbf16>, vector<64x32xbf16>, vector<16x32xf32> -> vector<16x32xf32>
    %146 = vector.extract_strided_slice %30 {offsets = [5, 0], sizes = [1, 32], strides = [1, 1]} : vector<8x128xf32> to vector<1x32xf32>
    %147 = vector.broadcast %146 : vector<1x32xf32> to vector<16x32xf32>
    %148 = arith.addf %145, %147 : vector<16x32xf32>
    %149 = arith.addf %148, %121 : vector<16x32xf32>
    %150 = vector.extract_strided_slice %30 {offsets = [6, 0], sizes = [1, 32], strides = [1, 1]} : vector<8x128xf32> to vector<1x32xf32>
    %151 = vector.extract_strided_slice %30 {offsets = [7, 0], sizes = [1, 32], strides = [1, 1]} : vector<8x128xf32> to vector<1x32xf32>
    %cst_43 = arith.constant dense<0.000000e+00> : vector<16xf32>
    %152 = vector.multi_reduction <add>, %149, %cst_43 [1] : vector<16x32xf32> to vector<16xf32>
    %153 = vector.shape_cast %152 : vector<16xf32> to vector<16x1xf32>
    %154 = arith.mulf %149, %149 : vector<16x32xf32>
    %cst_44 = arith.constant dense<0.000000e+00> : vector<16xf32>
    %155 = vector.multi_reduction <add>, %154, %cst_44 [1] : vector<16x32xf32> to vector<16xf32>
    %156 = vector.shape_cast %155 : vector<16xf32> to vector<16x1xf32>
    %cst_45 = arith.constant 3.125000e-02 : f32
    %157 = vector.broadcast %cst_45 : f32 to vector<16x1xf32>
    %158 = arith.mulf %153, %157 : vector<16x1xf32>
    %cst_46 = arith.constant 3.125000e-02 : f32
    %159 = vector.broadcast %cst_46 : f32 to vector<16x1xf32>
    %160 = arith.mulf %156, %159 : vector<16x1xf32>
    %161 = arith.mulf %158, %158 : vector<16x1xf32>
    %162 = arith.subf %160, %161 : vector<16x1xf32>
    %163 = vector.broadcast %158 : vector<16x1xf32> to vector<16x32xf32>
    %164 = arith.subf %149, %163 : vector<16x32xf32>
    %cst_47 = arith.constant 9.99999996E-13 : f32
    %165 = vector.broadcast %cst_47 : f32 to vector<16x1xf32>
    %166 = arith.addf %162, %165 : vector<16x1xf32>
    %167 = math.rsqrt %166 : vector<16x1xf32>
    %168 = vector.broadcast %167 : vector<16x1xf32> to vector<16x32xf32>
    %169 = arith.mulf %164, %168 : vector<16x32xf32>
    %170 = vector.broadcast %150 : vector<1x32xf32> to vector<16x32xf32>
    %171 = arith.mulf %169, %170 : vector<16x32xf32>
    %172 = vector.broadcast %151 : vector<1x32xf32> to vector<16x32xf32>
    %173 = arith.addf %171, %172 : vector<16x32xf32>
    %c2 = arith.constant 2 : index
    %c0_48 = arith.constant 0 : index
    %c0_49 = arith.constant 0 : index
    %174 = vector.load %arg2[%c2, %c0_48, %c0_49] : memref<3x8x128xf32, #tpu.memory_space<vmem>>, vector<1x8x128xf32>
    %175 = vector.shape_cast %174 : vector<1x8x128xf32> to vector<8x128xf32>
    %176 = arith.truncf %173 : vector<16x32xf32> to vector<16x32xbf16>
    %c1_50 = arith.constant 1 : index
    %c0_51 = arith.constant 0 : index
    %c0_52 = arith.constant 0 : index
    %177 = vector.load %arg3[%c1_50, %c0_51, %c0_52] : memref<2x32x96xbf16, #tpu.memory_space<vmem>>, vector<1x32x96xbf16>
    %178 = vector.shape_cast %177 : vector<1x32x96xbf16> to vector<32x96xbf16>
    %cst_53 = arith.constant dense<0.000000e+00> : vector<16x96xf32>
    %179 = tpu.matmul %176, %178, %cst_53 {dimension_numbers = #tpu.dot_dimension_numbers<[1], [0], [0], [1], [0, 0, 1, 1], [], []>} : vector<16x32xbf16>, vector<32x96xbf16>, vector<16x96xf32> -> vector<16x96xf32>
    %180 = vector.extract_strided_slice %175 {offsets = [0, 0], sizes = [1, 96], strides = [1, 1]} : vector<8x128xf32> to vector<1x96xf32>
    %181 = vector.broadcast %180 : vector<1x96xf32> to vector<16x96xf32>
    %182 = arith.addf %179, %181 : vector<16x96xf32>
    %183 = vector.extract_strided_slice %182 {offsets = [0, 0], sizes = [16, 8], strides = [1, 1]} : vector<16x96xf32> to vector<16x8xf32>
    %184 = vector.shape_cast %183 : vector<16x8xf32> to vector<2x8x8xf32>
    %185 = vector.extract_strided_slice %182 {offsets = [0, 8], sizes = [16, 8], strides = [1, 1]} : vector<16x96xf32> to vector<16x8xf32>
    %186 = vector.shape_cast %185 : vector<16x8xf32> to vector<2x8x8xf32>
    %187 = vector.extract_strided_slice %182 {offsets = [0, 16], sizes = [16, 8], strides = [1, 1]} : vector<16x96xf32> to vector<16x8xf32>
    %188 = vector.shape_cast %187 : vector<16x8xf32> to vector<2x8x8xf32>
    %189 = vector.extract_strided_slice %182 {offsets = [0, 24], sizes = [16, 8], strides = [1, 1]} : vector<16x96xf32> to vector<16x8xf32>
    %190 = vector.shape_cast %189 : vector<16x8xf32> to vector<2x8x8xf32>
    %191 = tpu.concatenate %184, %186, %188, %190 in 0 : vector<2x8x8xf32>, vector<2x8x8xf32>, vector<2x8x8xf32>, vector<2x8x8xf32> -> vector<8x8x8xf32>
    %192 = vector.extract_strided_slice %182 {offsets = [0, 32], sizes = [16, 8], strides = [1, 1]} : vector<16x96xf32> to vector<16x8xf32>
    %193 = vector.shape_cast %192 : vector<16x8xf32> to vector<2x8x8xf32>
    %194 = vector.extract_strided_slice %182 {offsets = [0, 40], sizes = [16, 8], strides = [1, 1]} : vector<16x96xf32> to vector<16x8xf32>
    %195 = vector.shape_cast %194 : vector<16x8xf32> to vector<2x8x8xf32>
    %196 = vector.extract_strided_slice %182 {offsets = [0, 48], sizes = [16, 8], strides = [1, 1]} : vector<16x96xf32> to vector<16x8xf32>
    %197 = vector.shape_cast %196 : vector<16x8xf32> to vector<2x8x8xf32>
    %198 = vector.extract_strided_slice %182 {offsets = [0, 56], sizes = [16, 8], strides = [1, 1]} : vector<16x96xf32> to vector<16x8xf32>
    %199 = vector.shape_cast %198 : vector<16x8xf32> to vector<2x8x8xf32>
    %200 = tpu.concatenate %193, %195, %197, %199 in 0 : vector<2x8x8xf32>, vector<2x8x8xf32>, vector<2x8x8xf32>, vector<2x8x8xf32> -> vector<8x8x8xf32>
    %201 = vector.extract_strided_slice %182 {offsets = [0, 64], sizes = [16, 8], strides = [1, 1]} : vector<16x96xf32> to vector<16x8xf32>
    %202 = vector.shape_cast %201 : vector<16x8xf32> to vector<2x8x8xf32>
    %203 = vector.extract_strided_slice %182 {offsets = [0, 72], sizes = [16, 8], strides = [1, 1]} : vector<16x96xf32> to vector<16x8xf32>
    %204 = vector.shape_cast %203 : vector<16x8xf32> to vector<2x8x8xf32>
    %205 = vector.extract_strided_slice %182 {offsets = [0, 80], sizes = [16, 8], strides = [1, 1]} : vector<16x96xf32> to vector<16x8xf32>
    %206 = vector.shape_cast %205 : vector<16x8xf32> to vector<2x8x8xf32>
    %207 = vector.extract_strided_slice %182 {offsets = [0, 88], sizes = [16, 8], strides = [1, 1]} : vector<16x96xf32> to vector<16x8xf32>
    %208 = vector.shape_cast %207 : vector<16x8xf32> to vector<2x8x8xf32>
    %209 = tpu.concatenate %202, %204, %206, %208 in 0 : vector<2x8x8xf32>, vector<2x8x8xf32>, vector<2x8x8xf32>, vector<2x8x8xf32> -> vector<8x8x8xf32>
    "tpu.trace_start"() <{level = 10 : i32, message = "gqd,gkd->gqk"}> : () -> ()
    %cst_54 = arith.constant dense<0.000000e+00> : vector<8x8x8xf32>
    %210 = tpu.matmul %191, %200, %cst_54 {dimension_numbers = #tpu.dot_dimension_numbers<[2], [2], [1], [1], [0, 0, 0, 1, 1, 1], [0], [0]>} : vector<8x8x8xf32>, vector<8x8x8xf32>, vector<8x8x8xf32> -> vector<8x8x8xf32>
    "tpu.trace_stop"() : () -> ()
    %cst_55 = arith.constant 0.353553385 : f32
    %211 = vector.broadcast %cst_55 : f32 to vector<8x8x8xf32>
    %212 = arith.mulf %210, %211 : vector<8x8x8xf32>
    %213 = vector.broadcast %1 : vector<8x1x8xf32> to vector<8x8x8xf32>
    %214 = arith.addf %212, %213 : vector<8x8x8xf32>
    %cst_56 = arith.constant dense<0xFF800000> : vector<8x8xf32>
    %215 = vector.multi_reduction <maximumf>, %214, %cst_56 [2] : vector<8x8x8xf32> to vector<8x8xf32>
    %216 = vector.shape_cast %215 : vector<8x8xf32> to vector<8x8x1xf32>
    %217 = vector.broadcast %216 : vector<8x8x1xf32> to vector<8x8x8xf32>
    %218 = arith.subf %214, %217 : vector<8x8x8xf32>
    %219 = math.exp %218 : vector<8x8x8xf32>
    %cst_57 = arith.constant dense<0.000000e+00> : vector<8x8xf32>
    %220 = vector.multi_reduction <add>, %219, %cst_57 [2] : vector<8x8x8xf32> to vector<8x8xf32>
    %221 = vector.shape_cast %220 : vector<8x8xf32> to vector<8x8x1xf32>
    %222 = tpu.reciprocal %221 {approx = true} : vector<8x8x1xf32> -> vector<8x8x1xf32>
    %223 = vector.broadcast %222 : vector<8x8x1xf32> to vector<8x8x8xf32>
    %224 = arith.mulf %219, %223 : vector<8x8x8xf32>
    "tpu.trace_start"() <{level = 10 : i32, message = "gqk,gkd->gqd"}> : () -> ()
    %cst_58 = arith.constant dense<0.000000e+00> : vector<8x8x8xf32>
    %225 = tpu.matmul %224, %209, %cst_58 {dimension_numbers = #tpu.dot_dimension_numbers<[2], [1], [1], [2], [0, 0, 0, 1, 1, 2], [0], [0]>} : vector<8x8x8xf32>, vector<8x8x8xf32>, vector<8x8x8xf32> -> vector<8x8x8xf32>
    "tpu.trace_stop"() : () -> ()
    %226 = vector.extract_strided_slice %225 {offsets = [0, 0, 0], sizes = [2, 8, 8], strides = [1, 1, 1]} : vector<8x8x8xf32> to vector<2x8x8xf32>
    %227 = vector.shape_cast %226 : vector<2x8x8xf32> to vector<16x8xf32>
    %228 = vector.extract_strided_slice %225 {offsets = [2, 0, 0], sizes = [2, 8, 8], strides = [1, 1, 1]} : vector<8x8x8xf32> to vector<2x8x8xf32>
    %229 = vector.shape_cast %228 : vector<2x8x8xf32> to vector<16x8xf32>
    %230 = vector.extract_strided_slice %225 {offsets = [4, 0, 0], sizes = [2, 8, 8], strides = [1, 1, 1]} : vector<8x8x8xf32> to vector<2x8x8xf32>
    %231 = vector.shape_cast %230 : vector<2x8x8xf32> to vector<16x8xf32>
    %232 = vector.extract_strided_slice %225 {offsets = [6, 0, 0], sizes = [2, 8, 8], strides = [1, 1, 1]} : vector<8x8x8xf32> to vector<2x8x8xf32>
    %233 = vector.shape_cast %232 : vector<2x8x8xf32> to vector<16x8xf32>
    %234 = tpu.concatenate %227, %229, %231, %233 in 1 : vector<16x8xf32>, vector<16x8xf32>, vector<16x8xf32>, vector<16x8xf32> -> vector<16x32xf32>
    %235 = arith.truncf %234 : vector<16x32xf32> to vector<16x32xbf16>
    %c1_59 = arith.constant 1 : index
    %c0_60 = arith.constant 0 : index
    %c0_61 = arith.constant 0 : index
    %236 = vector.load %arg4[%c1_59, %c0_60, %c0_61] : memref<2x32x32xbf16, #tpu.memory_space<vmem>>, vector<1x32x32xbf16>
    %237 = vector.shape_cast %236 : vector<1x32x32xbf16> to vector<32x32xbf16>
    %cst_62 = arith.constant dense<0.000000e+00> : vector<16x32xf32>
    %238 = tpu.matmul %235, %237, %cst_62 {dimension_numbers = #tpu.dot_dimension_numbers<[1], [0], [0], [1], [0, 0, 1, 1], [], []>} : vector<16x32xbf16>, vector<32x32xbf16>, vector<16x32xf32> -> vector<16x32xf32>
    %239 = vector.extract_strided_slice %175 {offsets = [1, 0], sizes = [1, 32], strides = [1, 1]} : vector<8x128xf32> to vector<1x32xf32>
    %240 = vector.broadcast %239 : vector<1x32xf32> to vector<16x32xf32>
    %241 = arith.addf %238, %240 : vector<16x32xf32>
    %242 = arith.addf %241, %173 : vector<16x32xf32>
    %243 = vector.extract_strided_slice %175 {offsets = [2, 0], sizes = [1, 32], strides = [1, 1]} : vector<8x128xf32> to vector<1x32xf32>
    %244 = vector.extract_strided_slice %175 {offsets = [3, 0], sizes = [1, 32], strides = [1, 1]} : vector<8x128xf32> to vector<1x32xf32>
    %cst_63 = arith.constant dense<0.000000e+00> : vector<16xf32>
    %245 = vector.multi_reduction <add>, %242, %cst_63 [1] : vector<16x32xf32> to vector<16xf32>
    %246 = vector.shape_cast %245 : vector<16xf32> to vector<16x1xf32>
    %247 = arith.mulf %242, %242 : vector<16x32xf32>
    %cst_64 = arith.constant dense<0.000000e+00> : vector<16xf32>
    %248 = vector.multi_reduction <add>, %247, %cst_64 [1] : vector<16x32xf32> to vector<16xf32>
    %249 = vector.shape_cast %248 : vector<16xf32> to vector<16x1xf32>
    %cst_65 = arith.constant 3.125000e-02 : f32
    %250 = vector.broadcast %cst_65 : f32 to vector<16x1xf32>
    %251 = arith.mulf %246, %250 : vector<16x1xf32>
    %cst_66 = arith.constant 3.125000e-02 : f32
    %252 = vector.broadcast %cst_66 : f32 to vector<16x1xf32>
    %253 = arith.mulf %249, %252 : vector<16x1xf32>
    %254 = arith.mulf %251, %251 : vector<16x1xf32>
    %255 = arith.subf %253, %254 : vector<16x1xf32>
    %256 = vector.broadcast %251 : vector<16x1xf32> to vector<16x32xf32>
    %257 = arith.subf %242, %256 : vector<16x32xf32>
    %cst_67 = arith.constant 9.99999996E-13 : f32
    %258 = vector.broadcast %cst_67 : f32 to vector<16x1xf32>
    %259 = arith.addf %255, %258 : vector<16x1xf32>
    %260 = math.rsqrt %259 : vector<16x1xf32>
    %261 = vector.broadcast %260 : vector<16x1xf32> to vector<16x32xf32>
    %262 = arith.mulf %257, %261 : vector<16x32xf32>
    %263 = vector.broadcast %243 : vector<1x32xf32> to vector<16x32xf32>
    %264 = arith.mulf %262, %263 : vector<16x32xf32>
    %265 = vector.broadcast %244 : vector<1x32xf32> to vector<16x32xf32>
    %266 = arith.addf %264, %265 : vector<16x32xf32>
    %267 = arith.truncf %266 : vector<16x32xf32> to vector<16x32xbf16>
    %c1_68 = arith.constant 1 : index
    %c0_69 = arith.constant 0 : index
    %c0_70 = arith.constant 0 : index
    %268 = vector.load %arg5[%c1_68, %c0_69, %c0_70] : memref<2x32x64xbf16, #tpu.memory_space<vmem>>, vector<1x32x64xbf16>
    %269 = vector.shape_cast %268 : vector<1x32x64xbf16> to vector<32x64xbf16>
    %cst_71 = arith.constant dense<0.000000e+00> : vector<16x64xf32>
    %270 = tpu.matmul %267, %269, %cst_71 {dimension_numbers = #tpu.dot_dimension_numbers<[1], [0], [0], [1], [0, 0, 1, 1], [], []>} : vector<16x32xbf16>, vector<32x64xbf16>, vector<16x64xf32> -> vector<16x64xf32>
    %271 = vector.extract_strided_slice %175 {offsets = [4, 0], sizes = [1, 64], strides = [1, 1]} : vector<8x128xf32> to vector<1x64xf32>
    %272 = vector.broadcast %271 : vector<1x64xf32> to vector<16x64xf32>
    %273 = arith.addf %270, %272 : vector<16x64xf32>
    %cst_72 = arith.constant 5.000000e-01 : f32
    %274 = vector.broadcast %cst_72 : f32 to vector<16x64xf32>
    %275 = arith.mulf %274, %273 : vector<16x64xf32>
    %cst_73 = arith.constant 4.471500e-02 : f32
    %276 = vector.broadcast %cst_73 : f32 to vector<16x64xf32>
    %277 = arith.mulf %276, %273 : vector<16x64xf32>
    %278 = arith.mulf %277, %273 : vector<16x64xf32>
    %279 = arith.mulf %278, %273 : vector<16x64xf32>
    %280 = arith.addf %273, %279 : vector<16x64xf32>
    %cst_74 = arith.constant 0.797884583 : f32
    %281 = vector.broadcast %cst_74 : f32 to vector<16x64xf32>
    %282 = arith.mulf %281, %280 : vector<16x64xf32>
    %283 = math.tanh %282 : vector<16x64xf32>
    %cst_75 = arith.constant 1.000000e+00 : f32
    %284 = vector.broadcast %cst_75 : f32 to vector<16x64xf32>
    %285 = arith.addf %284, %283 : vector<16x64xf32>
    %286 = arith.mulf %275, %285 : vector<16x64xf32>
    %287 = arith.truncf %286 : vector<16x64xf32> to vector<16x64xbf16>
    %c1_76 = arith.constant 1 : index
    %c0_77 = arith.constant 0 : index
    %c0_78 = arith.constant 0 : index
    %288 = vector.load %arg6[%c1_76, %c0_77, %c0_78] : memref<2x64x32xbf16, #tpu.memory_space<vmem>>, vector<1x64x32xbf16>
    %289 = vector.shape_cast %288 : vector<1x64x32xbf16> to vector<64x32xbf16>
    %cst_79 = arith.constant dense<0.000000e+00> : vector<16x32xf32>
    %290 = tpu.matmul %287, %289, %cst_79 {dimension_numbers = #tpu.dot_dimension_numbers<[1], [0], [0], [1], [0, 0, 1, 1], [], []>} : vector<16x64xbf16>, vector<64x32xbf16>, vector<16x32xf32> -> vector<16x32xf32>
    %291 = vector.extract_strided_slice %175 {offsets = [5, 0], sizes = [1, 32], strides = [1, 1]} : vector<8x128xf32> to vector<1x32xf32>
    %292 = vector.broadcast %291 : vector<1x32xf32> to vector<16x32xf32>
    %293 = arith.addf %290, %292 : vector<16x32xf32>
    %294 = arith.addf %293, %266 : vector<16x32xf32>
    %295 = vector.extract_strided_slice %175 {offsets = [6, 0], sizes = [1, 32], strides = [1, 1]} : vector<8x128xf32> to vector<1x32xf32>
    %296 = vector.extract_strided_slice %175 {offsets = [7, 0], sizes = [1, 32], strides = [1, 1]} : vector<8x128xf32> to vector<1x32xf32>
    %cst_80 = arith.constant dense<0.000000e+00> : vector<16xf32>
    %297 = vector.multi_reduction <add>, %294, %cst_80 [1] : vector<16x32xf32> to vector<16xf32>
    %298 = vector.shape_cast %297 : vector<16xf32> to vector<16x1xf32>
    %299 = arith.mulf %294, %294 : vector<16x32xf32>
    %cst_81 = arith.constant dense<0.000000e+00> : vector<16xf32>
    %300 = vector.multi_reduction <add>, %299, %cst_81 [1] : vector<16x32xf32> to vector<16xf32>
    %301 = vector.shape_cast %300 : vector<16xf32> to vector<16x1xf32>
    %cst_82 = arith.constant 3.125000e-02 : f32
    %302 = vector.broadcast %cst_82 : f32 to vector<16x1xf32>
    %303 = arith.mulf %298, %302 : vector<16x1xf32>
    %cst_83 = arith.constant 3.125000e-02 : f32
    %304 = vector.broadcast %cst_83 : f32 to vector<16x1xf32>
    %305 = arith.mulf %301, %304 : vector<16x1xf32>
    %306 = arith.mulf %303, %303 : vector<16x1xf32>
    %307 = arith.subf %305, %306 : vector<16x1xf32>
    %308 = vector.broadcast %303 : vector<16x1xf32> to vector<16x32xf32>
    %309 = arith.subf %294, %308 : vector<16x32xf32>
    %cst_84 = arith.constant 9.99999996E-13 : f32
    %310 = vector.broadcast %cst_84 : f32 to vector<16x1xf32>
    %311 = arith.addf %307, %310 : vector<16x1xf32>
    %312 = math.rsqrt %311 : vector<16x1xf32>
    %313 = vector.broadcast %312 : vector<16x1xf32> to vector<16x32xf32>
    %314 = arith.mulf %309, %313 : vector<16x32xf32>
    %315 = vector.broadcast %295 : vector<1x32xf32> to vector<16x32xf32>
    %316 = arith.mulf %314, %315 : vector<16x32xf32>
    %317 = vector.broadcast %296 : vector<1x32xf32> to vector<16x32xf32>
    %318 = arith.addf %316, %317 : vector<16x32xf32>
    %319 = vector.shape_cast %318 : vector<16x32xf32> to vector<2x8x32xf32>
    %320 = vector.extract_strided_slice %319 {offsets = [0, 0, 0], sizes = [2, 1, 32], strides = [1, 1, 1]} : vector<2x8x32xf32> to vector<2x1x32xf32>
    %321 = vector.shape_cast %320 : vector<2x1x32xf32> to vector<2x32xf32>
    %c0_85 = arith.constant 0 : index
    %c0_86 = arith.constant 0 : index
    %322 = vector.load %arg7[%c0_85, %c0_86] : memref<2x32xf32, #tpu.memory_space<vmem>>, vector<2x32xf32>
    tpu.vector_store %arg7[%c0_85, %c0_86], %321 {strides = array<i32>} : memref<2x32xf32, #tpu.memory_space<vmem>>, vector<2x32xf32>,
    return
  }
}

</mosaic_0001>

<bundles_post_ra>
// kernel: bert_feature_forward.1
= control target key start
LH: loop header
LB: loop body
LE: loop exit
PB: predicated region body
PF: predicated region fallthrough
CT: control target
= control target key end

     0   :  { %vm33_vm0 = vcmask 261120   ;;  %s2690_s0 = inlined_call_operand.vmem [shape: f32[16,32], index: 0, kind: input, shape index: {}]   ;;  %s2691_s1 = inlined_call_operand.vmem [shape: f32[2,1,8], index: 1, kind: input, shape index: {}]   ;;  %s2692_s2 = inlined_call_operand.vmem [shape: f32[3,8,128], index: 2, kind: input, shape index: {}]   ;;  %s2693_s3 = inlined_call_operand.vmem [shape: bf16[2,32,96], index: 3, kind: input, shape index: {}]   ;;  %s2694_s4 = inlined_call_operand.vmem [shape: bf16[2,32,32], index: 4, kind: input, shape index: {}]   ;;  %s2695_s5 = inlined_call_operand.vmem [shape: bf16[2,32,64], index: 5, kind: input, shape index: {}]   ;;  %s2696_s6 = inlined_call_operand.vmem [shape: bf16[2,64,32], index: 6, kind: input, shape index: {}]   ;;  %s2697_s7 = inlined_call_operand.hbm [shape: f32[2,32], index: 7, kind: output, shape index: {}]  }
   0x1   :  { %v31_v0 = vld [vmem:[%s2690_s0] sm:$0xff] }
   0x2   :  { %v34_v1 = vsel %vm33_vm0, %v31_v0, 0.0  ;;  %v40_v2 = vmul.f32 %v31_v0, %v31_v0 }
   0x3   :  { %12 = vsyncpa [#allocation3], 0  ;;  %35 = vadd.xlane.f32.xlu0 %v34_v1  ;;  %v32_v3 = vld [vmem:[%s2690_s0 + $0x8] sm:$0xff]  ;;  %v1988_v14 = vld [vmem:[%s2693_s3] sm:$0xff]  ;;  %s2207_s12 = smov 112   ;;  %s2208_s13 = smov 104  }
   0x4   :  { %v42_v4 = vsel %vm33_vm0, %v40_v2, 0.0  ;;  %v41_v5 = vmul.f32 %v32_v3, %v32_v3  ;;  %v37_v6 = vsel %vm33_vm0, %v32_v3, 0.0  ;;  %v1989_v11 = vld [vmem:[%s2693_s3 + $0x8] sm:$0xff]  ;;  %v30_v35 = vld [vmem:[%s2692_s2] sm:$0xff]  ;;  %s2209_s14 = smov 120   ;;  %s2210_s15 = smov 96  }
   0x5   :  { %43 = vadd.xlane.f32.xlu1 %v42_v4  ;;  %117 = vmatpush.bf16.msra.mxu0 %v1989_v11  ;;  %v82_v39 = vperm.slane %v30_v35, 0  ;;  %v85_v45 = vperm.slane %v30_v35, 1  ;;  %v2285_v50 = vld [vmem:[%s2692_s2 + $0x8] sm:$0xff]  ;;  %vm141_vm7 = vcmask 64512   ;;  %s2212_s20 = smov 8   ;;  %s2213_s21 = smov 24  }
   0x6   :  { %v45_v7 = vsel %vm33_vm0, %v41_v5, 0.0  ;;  %v95_v51 = vperm.slane %v2285_v50, 0  ;;  %s2214_s22 = smov 16   ;;  %vm692_vm8 = vcmask 130048   ;;  %vm695_vm9 = vcmask 195584   ;;  %s1821_s11 = sshll.u32 %s2697_s7, 4  ;;  %s1822_s11 = int_to_ptr.hbm [resolvable:$true] %s1821_s11 }
   0x9   :  { %118 = vmatpush.bf16.msra.mxu0 %v1988_v14 }
   0xb   :  { %38 = vadd.xlane.f32.xlu0 %v37_v6  ;;  %v2359_v6 = vld [vmem:[%s2691_s1 + $0x1] ss:$0 sm:$0xff] }
   0xd   :  { %46 = vadd.xlane.f32.xlu1 %v45_v7 }
  0x76   :  { %v36_v8 = vpop.xlane.xlu0 %35 }
  0x77   :  { %v48_v9 = vmul.f32 0.03125, %v36_v8  ;;  %v2364_v8 = vld [vmem:[%s2691_s1] ss:$0 sm:$0xff]  ;;  %s2211_s1 = smov 64  }
  0x78   :  { %v44_v10 = vpop.xlane.xlu1 %43 }
  0x79   :  { %v52_v12 = vmul.f32 %v48_v9, %v48_v9  ;;  %v50_v13 = vmul.f32 0.03125, %v44_v10  ;;  %v56_v36 = vsub.f32 %v31_v0, %v48_v9 }
  0x7b   :  { %v54_v15 = vsub.f32 %v50_v13, %v52_v12 }
  0x7d   :  { %v58_v16 = vadd.f32 1e-12, %v54_v15 }
  0x7e   :  { %v39_v17 = vpop.xlane.xlu0 %38 }
  0x7f   :  { %2089 = vrsqrt.f32 %v58_v16  ;;  %v49_v18 = vmul.f32 0.03125, %v39_v17  ;;  %vm66_vm2 = vweird.f32 %v58_v16 }
  0x80   :  { %v47_v19 = vpop.xlane.xlu1 %46 }
  0x81   :  { %v53_v20 = vmul.f32 %v49_v18, %v49_v18  ;;  %v51_v21 = vmul.f32 0.03125, %v47_v19  ;;  %v57_v41 = vsub.f32 %v32_v3, %v49_v18 }
  0x83   :  { %v55_v22 = vsub.f32 %v51_v21, %v53_v20 }
  0x85   :  { %v2090_v23 = vpop.eup %2089  ;;  %v59_v24 = vadd.f32 1e-12, %v55_v22 }
  0x86   :  { %v61_v25 = vmul.f32 %v2090_v23, %v58_v16  ;;  %vm67_vm1 = vweird.f32 %v2090_v23 }
  0x87   :  { %2091 = vrsqrt.f32 %v59_v24  ;;  %vm68_vm3 = vmor %vm66_vm2, %vm67_vm1  ;;  %vm76_vm5 = vweird.f32 %v59_v24  ;;  %vm876_vm1 = vcmask 523264  }
  0x88   :  { %v62_v26 = vmul.f32 %v2090_v23, %v61_v25 }
  0x8a   :  { %v63_v27 = vmul.f32 0.5, %v62_v26 }
  0x8c   :  { %v64_v28 = vsub.f32 1.5, %v63_v27 }
  0x8d   :  { %v2092_v29 = vpop.eup %2091 }
  0x8e   :  { %v65_v30 = vmul.f32 %v2090_v23, %v64_v28  ;;  %v71_v31 = vmul.f32 %v2092_v29, %v59_v24  ;;  %vm77_vm4 = vweird.f32 %v2092_v29 }
  0x8f   :  { %vm78_vm6 = vmor %vm76_vm5, %vm77_vm4 }
  0x90   :  { %v72_v32 = vmul.f32 %v2092_v29, %v71_v31  ;;  %v69_v33 = vsel %vm68_vm3, %v2090_v23, %v65_v30 }
  0x91   :  { %v80_v38 = vmul.f32 %v69_v33, %v56_v36 }
  0x92   :  { %v73_v34 = vmul.f32 0.5, %v72_v32 }
  0x93   :  { %v83_v44 = vmul.f32 %v82_v39, %v80_v38 }
  0x94   :  { %v74_v37 = vsub.f32 1.5, %v73_v34 }
  0x95   :  { %v2275_v47 = vadd.f32 %v85_v45, %v83_v44 }
  0x96   :  { %v75_v40 = vmul.f32 %v2092_v29, %v74_v37 }
  0x98   :  { %v79_v42 = vsel %vm78_vm6, %v2092_v29, %v75_v40 }
  0x99   :  { %v81_v43 = vmul.f32 %v79_v42, %v57_v41 }
  0x9b   :  { %v84_v46 = vmul.f32 %v82_v39, %v81_v43 }
  0x9d   :  { %v2277_v48 = vadd.f32 %v85_v45, %v84_v46 }
  0x9f   :  { %v90_v49 = vpack.c.bf16 %v2277_v48, %v2275_v47 }
  0xa1   :  { %1839 = vmatmul.msk.bf16.vlgmr.msra.gmra.mxu0 %vm33_vm0, %v90_v49 }
 0x11e   :  { %v120_v52 = vpop.f32.mrf.mxu0 }
 0x11f   :  { %v2288_v53 = vadd.f32 %v120_v52, %v95_v51 }
 0x121   :  { %131 = vrot.lane.b32.xlu2 %v2288_v53, %s2207_s12 }
 0x126   :  { %v122_v54 = vpop.f32.mrf.mxu0 }
 0x127   :  { %v2292_v55 = vadd.f32 %v122_v54, %v95_v51 }
 0x129   :  { %137 = vrot.lane.b32.xlu1 %v2292_v55, %s2208_s13  ;;  %129 = vrot.lane.b32.xlu0 %v2292_v55, %s2209_s14 }
 0x12a   :  { %127 = vrot.lane.b32.xlu2 %v2288_v53, %s2209_s14 }
 0x131   :  { %139 = vrot.lane.b32.xlu0 %v2288_v53, %s2210_s15 }
 0x132   :  { %133 = vrot.lane.b32.xlu2 %v2292_v55, %s2207_s12 }
 0x13a   :  { %135 = vrot.lane.b32.xlu2 %v2288_v53, %s2208_s13 }
 0x142   :  { %166 = vrot.lane.b32.xlu2 %v2292_v55, %s2210_s15 }
 0x17b   :  { %v2308_v56 = vpop.permute.xlu2 %131 }
 0x17c   :  { %244 = vrot.lane.b32.xlu2 %v2308_v56, %s2210_s15 }
 0x184   :  { %v2312_v57 = vpop.permute.xlu2 %127 }
 0x185   :  { %192 = vrot.lane.b32.xlu1 %v2312_v57, %s2210_s15 }
 0x18c   :  { %v2316_v58 = vpop.permute.xlu2 %133 }
 0x18d   :  { %270 = vrot.lane.b32.xlu1 %v2316_v58, %s2210_s15 }
 0x194   :  { %v2320_v59 = vpop.permute.xlu2 %135 }
 0x19b   :  { %v2322_v60 = vpop.permute.xlu1 %137  ;;  %v2324_v61 = vpop.permute.xlu0 %129 }
 0x19c   :  { %v167_v62 = vpop.permute.xlu2 %166  ;;  %218 = vrot.lane.b32.xlu0 %v2324_v61, %s2210_s15  ;;  %322 = vrot.lane.b32.xlu2 %v2322_v60, %s2210_s15  ;;  %v2017_v54 = vpack.i.bf16 %v2324_v61, %v2288_v53 }
 0x19d   :  { %1842 = vmatpush.xpose.msk.msra.mxu3 %vm141_vm7, %v167_v62 }
 0x1a0   :  { %1843 = vmatmul.msk.f32.vlgmr.msra.gmra.mxu3 %vm141_vm7, %v2292_v55 }
 0x1a3   :  { %v140_v63 = vpop.permute.xlu0 %139 }
 0x1a4   :  { %1840 = vmatpush.xpose.msk.msra.mxu1 %vm141_vm7, %v140_v63  ;;  %296 = vrot.lane.b32.xlu0 %v2320_v59, %s2210_s15 }
 0x1a7   :  { %1841 = vmatmul.msk.f32.vlgmr.msra.gmra.mxu1 %vm141_vm7, %v2288_v53 }
 0x1d6   :  { %v245_v0 = vpop.permute.xlu2 %244 }
 0x1d7   :  { %1848 = vmatpush.xpose.msk.msra.mxu2 %vm141_vm7, %v245_v0 }
 0x1da   :  { %1849 = vmatmul.msk.f32.vlgmr.msra.gmra.mxu2 %vm141_vm7, %v2308_v56 }
 0x1f6   :  { %v323_v1 = vpop.permute.xlu2 %322 }
 0x1f7   :  { %v193_v2 = vpop.permute.xlu1 %192  ;;  %1854 = vmatpush.xpose.msk.msrb.mxu2 %vm141_vm7, %v323_v1 }
 0x1f8   :  { %1844 = vmatpush.xpose.msk.msrb.mxu3 %vm141_vm7, %v193_v2 }
 0x1fa   :  { %1855 = vmatmul.msk.f32.vlgmr.msrb.gmra.mxu2 %vm141_vm7, %v2322_v60 }
 0x1fb   :  { %1845 = vmatmul.msk.f32.vlgmr.msrb.gmra.mxu3 %vm141_vm7, %v2312_v57 }
 0x1ff   :  { %v271_v3 = vpop.permute.xlu1 %270 }
 0x200   :  { %1850 = vmatpush.xpose.msk.msra.mxu3 %vm141_vm7, %v271_v3 }
 0x203   :  { %1851 = vmatmul.msk.f32.vlgmr.msra.gmra.mxu3 %vm141_vm7, %v2316_v58 }
 0x20e   :  { %v219_v4 = vpop.permute.xlu0 %218 }
 0x20f   :  { %1846 = vmatpush.xpose.msk.msrb.mxu1 %vm141_vm7, %v219_v4 }
 0x212   :  { %1847 = vmatmul.msk.f32.vlgmr.msrb.gmra.mxu1 %vm141_vm7, %v2324_v61 }
 0x216   :  { %v297_v5 = vpop.permute.xlu0 %296 }
 0x217   :  { %1852 = vmatpush.xpose.msk.msra.mxu1 %vm141_vm7, %v297_v5 }
 0x21a   :  { %1853 = vmatmul.msk.f32.vlgmr.msra.gmra.mxu1 %vm141_vm7, %v2320_v59 }
 0x223   :  { %v189_v7 = vpop.f32.mrf.mxu3 }
 0x224   :  { %v349_v9 = vmul.f32 0.35355338, %v189_v7  ;;  %v163_v10 = vpop.f32.mrf.mxu1 }
 0x225   :  { %v348_v11 = vmul.f32 0.35355338, %v163_v10 }
 0x226   :  { %v363_v12 = vadd.f32 %v2359_v6, %v349_v9 }
 0x227   :  { %v362_v13 = vadd.f32 %v2364_v8, %v348_v11 }
 0x228   :  { %v373_v14 = vsel %vm141_vm7, %v363_v12, -inf }
 0x229   :  { %374 = vmax.xlane.f32.xlu0 %v373_v14  ;;  %v370_v15 = vsel %vm141_vm7, %v362_v13, -inf }
 0x22a   :  { %371 = vmax.xlane.f32.xlu2 %v370_v15 }
 0x25d   :  { %v267_v16 = vpop.f32.mrf.mxu2 }
 0x25e   :  { %v352_v17 = vmul.f32 0.35355338, %v267_v16  ;;  %v2032_v16 = vpack.i.bf16 %v2320_v59, %v2316_v58  ;;  %v2022_v59 = vpack.i.bf16 %v2312_v57, %v2292_v55 }
 0x260   :  { %v366_v18 = vadd.f32 %v2364_v8, %v352_v17 }
 0x262   :  { %v382_v19 = vsel %vm141_vm7, %v366_v18, -inf }
 0x263   :  { %383 = vmax.xlane.f32.xlu1 %v382_v19 }
 0x27d   :  { %v345_v42 = vpop.f32.mrf.mxu2 }
 0x27e   :  { %v215_v20 = vpop.f32.mrf.mxu3  ;;  %v355_v46 = vmul.f32 0.35355338, %v345_v42 }
 0x27f   :  { %v350_v21 = vmul.f32 0.35355338, %v215_v20 }
 0x280   :  { %v369_v51 = vadd.f32 %v2359_v6, %v355_v46 }
 0x281   :  { %v364_v22 = vadd.f32 %v2364_v8, %v350_v21 }
 0x282   :  { %v391_v52 = vsel %vm141_vm7, %v369_v51, -inf }
 0x283   :  { %v376_v23 = vsel %vm141_vm7, %v364_v22, -inf }
 0x284   :  { %377 = vmax.xlane.f32.xlu2 %v376_v23 }
 0x286   :  { %v293_v24 = vpop.f32.mrf.mxu3 }
 0x287   :  { %v353_v25 = vmul.f32 0.35355338, %v293_v24 }
 0x289   :  { %v367_v26 = vadd.f32 %v2359_v6, %v353_v25 }
 0x28b   :  { %v385_v27 = vsel %vm141_vm7, %v367_v26, -inf }
 0x28c   :  { %386 = vmax.xlane.f32.xlu2 %v385_v27 }
 0x28f   :  { %v241_v28 = vpop.f32.mrf.mxu1 }
 0x290   :  { %v351_v29 = vmul.f32 0.35355338, %v241_v28 }
 0x292   :  { %v365_v30 = vadd.f32 %v2359_v6, %v351_v29 }
 0x294   :  { %v379_v31 = vsel %vm141_vm7, %v365_v30, -inf }
 0x295   :  { %380 = vmax.xlane.f32.xlu1 %v379_v31 }
 0x297   :  { %v319_v32 = vpop.f32.mrf.mxu1 }
 0x298   :  { %v354_v33 = vmul.f32 0.35355338, %v319_v32 }
 0x29a   :  { %v368_v34 = vadd.f32 %v2364_v8, %v354_v33 }
 0x29c   :  { %v375_v35 = vpop.xlane.xlu0 %374  ;;  %v388_v36 = vsel %vm141_vm7, %v368_v34, -inf }
 0x29d   :  { %v395_v37 = vsub.f32 %v363_v12, %v375_v35  ;;  %389 = vmax.xlane.f32.xlu1 %v388_v36  ;;  %v372_v38 = vpop.xlane.xlu2 %371 }
 0x29e   :  { %v394_v39 = vsub.f32 %v362_v13, %v372_v38 }
 0x29f   :  { %v404_v40 = vmul.f32 1.442695, %v395_v37 }
 0x2a0   :  { %v402_v41 = vmul.f32 1.442695, %v394_v39 }
 0x2a1   :  { %2093 = vpow2.f32 %v404_v40 }
 0x2a2   :  { %2095 = vpow2.f32 %v402_v41 }
 0x2a7   :  { %v2380_v43 = vpop.eup %2093 }
 0x2a8   :  { %v2382_v44 = vpop.eup %2095  ;;  %v421_v45 = vsel %vm141_vm7, %v2380_v43, 0.0 }
 0x2a9   :  { %422 = vadd.xlane.f32.xlu1 %v421_v45  ;;  %v418_v49 = vsel %vm141_vm7, %v2382_v44, 0.0 }
 0x2aa   :  { %419 = vadd.xlane.f32.xlu0 %v418_v49 }
 0x2b2   :  { %392 = vmax.xlane.f32.xlu0 %v391_v52 }
 0x2c6   :  { %2018 = vrot.lane.b32.xlu0 %v2017_v54, %s2211_s1 }
 0x2d6   :  { %v384_v62 = vpop.xlane.xlu1 %383 }
 0x2d7   :  { %v398_v63 = vsub.f32 %v366_v18, %v384_v62 }
 0x2d9   :  { %v410_v0 = vmul.f32 1.442695, %v398_v63 }
 0x2db   :  { %2097 = vpow2.f32 %v410_v0 }
 0x2e1   :  { %v2393_v1 = vpop.eup %2097 }
 0x2e2   :  { %v430_v2 = vsel %vm141_vm7, %v2393_v1, 0.0 }
 0x2e3   :  { %431 = vadd.xlane.f32.xlu2 %v430_v2 }
 0x2f7   :  { %v378_v3 = vpop.xlane.xlu2 %377 }
 0x2f8   :  { %v396_v4 = vsub.f32 %v364_v22, %v378_v3 }
 0x2fa   :  { %v406_v5 = vmul.f32 1.442695, %v396_v4 }
 0x2fc   :  { %2099 = vpow2.f32 %v406_v5 }
 0x2ff   :  { %v387_v61 = vpop.xlane.xlu2 %386 }
 0x300   :  { %v399_v11 = vsub.f32 %v367_v26, %v387_v61 }
 0x302   :  { %v2397_v7 = vpop.eup %2099  ;;  %v412_v13 = vmul.f32 1.442695, %v399_v11 }
 0x303   :  { %v424_v53 = vsel %vm141_vm7, %v2397_v7, 0.0 }
 0x304   :  { %425 = vadd.xlane.f32.xlu0 %v424_v53 }
 0x308   :  { %v381_v9 = vpop.xlane.xlu1 %380 }
 0x309   :  { %v397_v10 = vsub.f32 %v365_v30, %v381_v9 }
 0x30b   :  { %v408_v12 = vmul.f32 1.442695, %v397_v10 }
 0x30d   :  { %2101 = vpow2.f32 %v408_v12 }
 0x30e   :  { %2103 = vpow2.f32 %v412_v13 }
 0x310   :  { %v390_v20 = vpop.xlane.xlu1 %389 }
 0x311   :  { %v400_v23 = vsub.f32 %v368_v34, %v390_v20  ;;  %v2027_v34 = vpack.i.bf16 %v2322_v60, %v2308_v56  ;;  %v1990_v20 = vld [vmem:[%s2694_s4] sm:$0xff] }
 0x313   :  { %v2102_v14 = vpop.eup %2101  ;;  %v414_v25 = vmul.f32 1.442695, %v400_v23 }
 0x314   :  { %v427_v15 = vsel %vm141_vm7, %v2102_v14, 0.0  ;;  %v2104_v17 = vpop.eup %2103 }
 0x315   :  { %428 = vadd.xlane.f32.xlu2 %v427_v15  ;;  %v433_v18 = vsel %vm141_vm7, %v2104_v17, 0.0 }
 0x318   :  { %2033 = vrot.lane.b32.xlu0 %v2032_v16, %s2211_s1 }
 0x31c   :  { %v423_v35 = vpop.xlane.xlu1 %422 }
 0x31d   :  { %v420_v19 = vpop.xlane.xlu0 %419  ;;  %434 = vadd.xlane.f32.xlu2 %v433_v18 }
 0x325   :  { %v393_v21 = vpop.xlane.xlu0 %392 }
 0x326   :  { %v401_v22 = vsub.f32 %v369_v51, %v393_v21 }
 0x328   :  { %v416_v24 = vmul.f32 1.442695, %v401_v22 }
 0x32a   :  { %2105 = vpow2.f32 %v416_v24 }
 0x32b   :  { %2107 = vpow2.f32 %v414_v25 }
 0x32c   :  { %2109 = vrcp.f32 %v420_v19  ;;  %v1991_v19 = vld [vmem:[%s2694_s4 + $0x8] sm:$0xff] }
 0x330   :  { %v2406_v26 = vpop.eup %2105 }
 0x331   :  { %v439_v58 = vsel %vm141_vm7, %v2406_v26, 0.0  ;;  %v2108_v27 = vpop.eup %2107 }
 0x332   :  { %440 = vadd.xlane.f32.xlu1 %v439_v58  ;;  %v2110_v28 = vpop.eup %2109  ;;  %v436_v32 = vsel %vm141_vm7, %v2108_v27, 0.0 }
 0x333   :  { %v450_v33 = vmul.f32 %v2110_v28, %v2382_v44 }
 0x335   :  { %2023 = vrot.lane.b32.xlu2 %v2022_v59, %s2211_s1 }
 0x338   :  { %v2019_v29 = vpop.permute.xlu0 %2018 }
 0x339   :  { %v2021_v30 = vunpack.i.h.bf16 %v2019_v29  ;;  %v2020_v31 = vunpack.i.l.bf16 %v2019_v29 }
 0x33a   :  { %437 = vadd.xlane.f32.xlu1 %v436_v32 }
 0x33b   :  { %479 = vmatpush.msrb.mxu3 %v2020_v31  ;;  %557 = vmatpush.msra.mxu2 %v2021_v30 }
 0x33c   :  { %1856 = vmatmul.msk.f32.vlgmr.msrb.gmra.mxu3 %vm141_vm7, %v450_v33 }
 0x353   :  { %2028 = vrot.lane.b32.xlu1 %v2027_v34, %s2211_s1 }
 0x356   :  { %v432_v55 = vpop.xlane.xlu2 %431 }
 0x377   :  { %v426_v36 = vpop.xlane.xlu0 %425 }
 0x388   :  { %v429_v57 = vpop.xlane.xlu2 %428 }
 0x389   :  { %2111 = vrcp.f32 %v429_v57 }
 0x38a   :  { %2113 = vrcp.f32 %v423_v35  ;;  %v2034_v42 = vpop.permute.xlu0 %2033 }
 0x38b   :  { %2115 = vrcp.f32 %v426_v36  ;;  %v2036_v49 = vunpack.i.h.bf16 %v2034_v42  ;;  %v2035_v51 = vunpack.i.l.bf16 %v2034_v42 }
 0x38f   :  { %v2112_v37 = vpop.eup %2111 }
 0x390   :  { %v453_v38 = vmul.f32 %v2112_v37, %v2102_v14  ;;  %v435_v39 = vpop.xlane.xlu2 %434  ;;  %v2114_v40 = vpop.eup %2113 }
 0x391   :  { %v2116_v41 = vpop.eup %2115  ;;  %2117 = vrcp.f32 %v435_v39  ;;  %v451_v46 = vmul.f32 %v2114_v40, %v2380_v43 }
 0x392   :  { %1859 = vmatmul.msk.f32.vlgmr.msra.gmra.mxu2 %vm141_vm7, %v453_v38  ;;  %v452_v45 = vmul.f32 %v2116_v41, %v2397_v7 }
 0x397   :  { %v2118_v52 = vpop.eup %2117 }
 0x398   :  { %v2024_v44 = vpop.permute.xlu2 %2023  ;;  %v455_v54 = vmul.f32 %v2118_v52, %v2104_v17  ;;  %v1993_v52 = vld [vmem:[%s2695_s5 + $0x8] sm:$0xff] }
 0x399   :  { %v2026_v56 = vunpack.i.h.bf16 %v2024_v44  ;;  %v2025_v60 = vunpack.i.l.bf16 %v2024_v44 }
 0x39b   :  { %505 = vmatpush.msrb.mxu0 %v2025_v60  ;;  %531 = vmatpush.msrb.mxu1 %v2026_v56 }
 0x39c   :  { %1857 = vmatmul.msk.f32.vlgmr.msrb.gmra.mxu0 %vm141_vm7, %v451_v46  ;;  %1858 = vmatmul.msk.f32.vlgmr.msrb.gmra.mxu1 %vm141_vm7, %v452_v45 }
 0x39d   :  { %609 = vmatpush.msra.mxu0 %v2035_v51  ;;  %635 = vmatpush.msra.mxu1 %v2036_v49 }
 0x39f   :  { %816 = vmatpush.bf16.msrb.mxu0 %v1993_v52 }
 0x3a4   :  { %1861 = vmatmul.msk.f32.vlgmr.msra.gmra.mxu0 %vm141_vm7, %v455_v54 }
 0x3a5   :  { %v441_v62 = vpop.xlane.xlu1 %440 }
 0x3ad   :  { %v438_v63 = vpop.xlane.xlu1 %437 }
 0x3ae   :  { %2119 = vrcp.f32 %v438_v63 }
 0x3af   :  { %2121 = vrcp.f32 %v432_v55  ;;  %v703_v55 = vperm.slane %v2285_v50, 1 }
 0x3b0   :  { %2123 = vrcp.f32 %v441_v62 }
 0x3b4   :  { %v2120_v0 = vpop.eup %2119 }
 0x3b5   :  { %v456_v2 = vmul.f32 %v2120_v0, %v2108_v27  ;;  %v2122_v43 = vpop.eup %2121 }
 0x3b6   :  { %v2124_v3 = vpop.eup %2123  ;;  %v454_v53 = vmul.f32 %v2122_v43, %v2393_v1 }
 0x3b7   :  { %1862 = vmatmul.msk.f32.vlgmr.msra.gmra.mxu1 %vm141_vm7, %v456_v2  ;;  %v457_v61 = vmul.f32 %v2124_v3, %v2406_v26 }
 0x3bf   :  { %v481_v13 = vpop.f32.mrf.mxu3 }
 0x3c5   :  { %v2029_v4 = vpop.permute.xlu1 %2028 }
 0x3c6   :  { %v2031_v5 = vunpack.i.h.bf16 %v2029_v4  ;;  %v2030_v7 = vunpack.i.l.bf16 %v2029_v4 }
 0x3c8   :  { %583 = vmatpush.msra.mxu3 %v2030_v7  ;;  %661 = vmatpush.msrb.mxu2 %v2031_v5 }
 0x3c9   :  { %1860 = vmatmul.msk.f32.vlgmr.msra.gmra.mxu3 %vm141_vm7, %v454_v53  ;;  %1863 = vmatmul.msk.f32.vlgmr.msrb.gmra.mxu2 %vm141_vm7, %v457_v61 }
 0x3ca   :  { %725 = vmatpush.bf16.msrb.mxu3 %v1991_v19 }
 0x3ce   :  { %726 = vmatpush.bf16.msrb.mxu3 %v1990_v20 }
 0x415   :  { %v559_v9 = vpop.f32.mrf.mxu2 }
 0x419   :  { %v533_v10 = vpop.f32.mrf.mxu1  ;;  %v507_v12 = vpop.f32.mrf.mxu0 }
 0x41a   :  { %v2037_v11 = vpack.i.bf16 %v559_v9, %v533_v10 }
 0x41c   :  { %2038 = vrot.lane.b32.xlu0 %v2037_v11, %s2212_s20 }
 0x421   :  { %v611_v14 = vpop.f32.mrf.mxu0 }
 0x434   :  { %v637_v15 = vpop.f32.mrf.mxu1 }
 0x44c   :  { %v585_v16 = vpop.f32.mrf.mxu3  ;;  %v663_v1 = vpop.f32.mrf.mxu2 }
 0x44d   :  { %v2042_v17 = vpack.i.bf16 %v611_v14, %v585_v16  ;;  %v2047_v18 = vpack.i.bf16 %v663_v1, %v637_v15 }
 0x44f   :  { %2048 = vrot.lane.b32.xlu0 %v2047_v18, %s2213_s21  ;;  %2043 = vrot.lane.b32.xlu2 %v2042_v17, %s2214_s22  ;;  %v783_v18 = vperm.slane %v2285_v50, 2 }
 0x48e   :  { %v2039_v21 = vpop.permute.xlu0 %2038 }
 0x48f   :  { %v2041_v23 = vunpack.i.h.bf16 %v2039_v21  ;;  %v2040_v24 = vunpack.i.l.bf16 %v2039_v21 }
 0x491   :  { %v690_v59 = vsel %vm141_vm7, %v481_v13, %v2040_v24  ;;  %v691_v27 = vsel %vm141_vm7, %v507_v12, %v2041_v23 }
 0x4a9   :  { %v2044_v22 = vpop.permute.xlu2 %2043 }
 0x4aa   :  { %v2046_v25 = vunpack.i.h.bf16 %v2044_v22  ;;  %v2045_v26 = vunpack.i.l.bf16 %v2044_v22 }
 0x4ac   :  { %v694_v30 = vsel %vm692_vm8, %v691_v27, %v2046_v25  ;;  %v693_v31 = vsel %vm692_vm8, %v690_v59, %v2045_v26  ;;  %v786_v25 = vperm.slane %v2285_v50, 3 }
 0x4c1   :  { %v2049_v58 = vpop.permute.xlu0 %2048 }
 0x4c2   :  { %v2051_v28 = vunpack.i.h.bf16 %v2049_v58  ;;  %v2050_v29 = vunpack.i.l.bf16 %v2049_v58 }
 0x4c4   :  { %v696_v32 = vsel %vm695_vm9, %v693_v31, %v2050_v29  ;;  %v697_v33 = vsel %vm695_vm9, %v694_v30, %v2051_v28  ;;  %v1997_v28 = vld [vmem:[%s2696_s6 + $0x18] sm:$0xff]  ;;  %v1996_v29 = vld [vmem:[%s2696_s6 + $0x10] sm:$0xff]  ;;  %v1995_v30 = vld [vmem:[%s2696_s6 + $0x8] sm:$0xff] }
 0x4c5   :  { %v698_v34 = vpack.c.bf16 %v697_v33, %v696_v32  ;;  %884 = vmatpush.bf16.msrb.mxu1 %v1997_v28  ;;  %v1994_v31 = vld [vmem:[%s2696_s6] sm:$0xff]  ;;  %v794_v32 = vperm.slane %v2285_v50, 4 }
 0x4c7   :  { %1872 = vmatmul.msk.bf16.vlgmr.msrb.gmra.mxu3 %vm33_vm0, %v698_v34 }
 0x4c9   :  { %885 = vmatpush.bf16.msrb.mxu1 %v1996_v29 }
 0x4cd   :  { %886 = vmatpush.bf16.msrb.mxu1 %v1995_v30 }
 0x4d1   :  { %887 = vmatpush.bf16.msrb.mxu1 %v1994_v31 }
 0x54a   :  { %v728_v57 = vpop.f32.mrf.mxu3 }
 0x54b   :  { %v729_v35 = vadd.f32 %v728_v57, %v703_v55 }
 0x54d   :  { %v733_v36 = vadd.f32 %v729_v35, %v2275_v47 }
 0x54f   :  { %v735_v37 = vsel %vm33_vm0, %v733_v36, 0.0  ;;  %v741_v38 = vmul.f32 %v733_v36, %v733_v36 }
 0x550   :  { %736 = vadd.xlane.f32.xlu1 %v735_v37 }
 0x551   :  { %v743_v39 = vsel %vm33_vm0, %v741_v38, 0.0 }
 0x552   :  { %v730_v40 = vpop.f32.mrf.mxu3  ;;  %744 = vadd.xlane.f32.xlu0 %v743_v39 }
 0x553   :  { %v731_v41 = vadd.f32 %v730_v40, %v703_v55 }
 0x555   :  { %v734_v42 = vadd.f32 %v731_v41, %v2277_v48  ;;  %v1992_v48 = vld [vmem:[%s2695_s5] sm:$0xff] }
 0x556   :  { %817 = vmatpush.bf16.msrb.mxu0 %v1992_v48 }
 0x557   :  { %v738_v44 = vsel %vm33_vm0, %v734_v42, 0.0  ;;  %v742_v56 = vmul.f32 %v734_v42, %v734_v42 }
 0x558   :  { %739 = vadd.xlane.f32.xlu2 %v738_v44 }
 0x559   :  { %v746_v60 = vsel %vm33_vm0, %v742_v56, 0.0 }
 0x55a   :  { %747 = vadd.xlane.f32.xlu1 %v746_v60 }
 0x5c3   :  { %v737_v45 = vpop.xlane.xlu1 %736 }
 0x5c4   :  { %v749_v47 = vmul.f32 0.03125, %v737_v45 }
 0x5c5   :  { %v745_v46 = vpop.xlane.xlu0 %744 }
 0x5c6   :  { %v753_v49 = vmul.f32 %v749_v47, %v749_v47  ;;  %v751_v51 = vmul.f32 0.03125, %v745_v46  ;;  %v757_v1 = vsub.f32 %v733_v36, %v749_v47 }
 0x5c8   :  { %v755_v54 = vsub.f32 %v751_v51, %v753_v49 }
 0x5ca   :  { %v759_v62 = vadd.f32 1e-12, %v755_v54 }
 0x5cb   :  { %v740_v63 = vpop.xlane.xlu2 %739 }
 0x5cc   :  { %2125 = vrsqrt.f32 %v759_v62  ;;  %v750_v0 = vmul.f32 0.03125, %v740_v63  ;;  %vm767_vm11 = vweird.f32 %v759_v62 }
 0x5cd   :  { %v748_v2 = vpop.xlane.xlu1 %747 }
 0x5ce   :  { %v754_v43 = vmul.f32 %v750_v0, %v750_v0  ;;  %v752_v3 = vmul.f32 0.03125, %v748_v2  ;;  %v758_v21 = vsub.f32 %v734_v42, %v750_v0 }
 0x5d0   :  { %v756_v4 = vsub.f32 %v752_v3, %v754_v43 }
 0x5d2   :  { %v2126_v5 = vpop.eup %2125  ;;  %v760_v7 = vadd.f32 1e-12, %v756_v4 }
 0x5d3   :  { %v762_v53 = vmul.f32 %v2126_v5, %v759_v62  ;;  %vm768_vm10 = vweird.f32 %v2126_v5  ;;  %v851_v62 = vperm.slane %v2285_v50, 5 }
 0x5d4   :  { %2127 = vrsqrt.f32 %v760_v7  ;;  %vm769_vm12 = vmor %vm767_vm11, %vm768_vm10  ;;  %vm777_vm14 = vweird.f32 %v760_v7 }
 0x5d5   :  { %v763_v61 = vmul.f32 %v2126_v5, %v762_v53 }
 0x5d7   :  { %v764_v9 = vmul.f32 0.5, %v763_v61 }
 0x5d9   :  { %v765_v10 = vsub.f32 1.5, %v764_v9 }
 0x5da   :  { %v2128_v11 = vpop.eup %2127 }
 0x5db   :  { %v766_v12 = vmul.f32 %v2126_v5, %v765_v10  ;;  %v772_v13 = vmul.f32 %v2128_v11, %v760_v7  ;;  %vm778_vm13 = vweird.f32 %v2128_v11 }
 0x5dc   :  { %vm779_vm15 = vmor %vm777_vm14, %vm778_vm13 }
 0x5dd   :  { %v773_v14 = vmul.f32 %v2128_v11, %v772_v13  ;;  %v770_v15 = vsel %vm769_vm12, %v2126_v5, %v766_v12 }
 0x5de   :  { %v781_v19 = vmul.f32 %v770_v15, %v757_v1 }
 0x5df   :  { %v774_v16 = vmul.f32 0.5, %v773_v14 }
 0x5e0   :  { %v784_v23 = vmul.f32 %v783_v18, %v781_v19 }
 0x5e1   :  { %v775_v17 = vsub.f32 1.5, %v774_v16  ;;  %v1999_v16 = vld [vmem:[%s2693_s3 + $0x18] sm:$0xff] }
 0x5e2   :  { %v787_v58 = vadd.f32 %v786_v25, %v784_v23  ;;  %980 = vmatpush.bf16.msra.mxu2 %v1999_v16 }
 0x5e3   :  { %v776_v20 = vmul.f32 %v2128_v11, %v775_v17  ;;  %v1998_v17 = vld [vmem:[%s2693_s3 + $0x10] sm:$0xff] }
 0x5e5   :  { %v780_v22 = vsel %vm779_vm15, %v2128_v11, %v776_v20 }
 0x5e6   :  { %v782_v24 = vmul.f32 %v780_v22, %v758_v21  ;;  %981 = vmatpush.bf16.msra.mxu2 %v1998_v17 }
 0x5e8   :  { %v785_v26 = vmul.f32 %v783_v18, %v782_v24 }
 0x5ea   :  { %v788_v59 = vadd.f32 %v786_v25, %v785_v26 }
 0x5ec   :  { %v789_v27 = vpack.c.bf16 %v788_v59, %v787_v58 }
 0x5ee   :  { %1881 = vmatmul.msk.bf16.vlgmr.msrb.gmra.mxu0 %vm33_vm0, %v789_v27 }
 0x66b   :  { %v819_v33 = vpop.f32.mrf.mxu0 }
 0x66c   :  { %v820_v34 = vadd.f32 %v819_v33, %v794_v32 }
 0x66e   :  { %v826_v55 = vmul.f32 0.044715, %v820_v34  ;;  %v824_v46 = vmul.f32 0.5, %v820_v34 }
 0x670   :  { %v828_v57 = vmul.f32 %v826_v55, %v820_v34 }
 0x672   :  { %v830_v35 = vmul.f32 %v828_v57, %v820_v34 }
 0x673   :  { %v821_v36 = vpop.f32.mrf.mxu0 }
 0x674   :  { %v832_v37 = vadd.f32 %v830_v35, %v820_v34  ;;  %v822_v38 = vadd.f32 %v821_v36, %v794_v32  ;;  %v944_v35 = vperm.slane %v2285_v50, 6 }
 0x676   :  { %v827_v39 = vmul.f32 0.044715, %v822_v38  ;;  %v834_v40 = vmul.f32 0.7978846, %v832_v37  ;;  %v825_v49 = vmul.f32 0.5, %v822_v38 }
 0x678   :  { %v829_v41 = vmul.f32 %v827_v39, %v822_v38  ;;  %2129 = vtanh.f32 %v834_v40 }
 0x67a   :  { %v831_v42 = vmul.f32 %v829_v41, %v822_v38 }
 0x67c   :  { %v833_v44 = vadd.f32 %v831_v42, %v822_v38  ;;  %v947_v42 = vperm.slane %v2285_v50, 7 }
 0x67e   :  { %v835_v56 = vmul.f32 0.7978846, %v833_v44  ;;  %v2130_v60 = vpop.eup %2129 }
 0x67f   :  { %v838_v45 = vadd.f32 1.0, %v2130_v60 }
 0x680   :  { %2131 = vtanh.f32 %v835_v56 }
 0x681   :  { %v840_v52 = vmul.f32 %v838_v45, %v824_v46 }
 0x686   :  { %v2132_v47 = vpop.eup %2131 }
 0x687   :  { %v839_v51 = vadd.f32 1.0, %v2132_v47  ;;  %v2499_v47 = vld [vmem:[%s2692_s2 + $0x10] sm:$0xff] }
 0x688   :  { %v958_v46 = vperm.slane %v2499_v47, 0 }
 0x689   :  { %v841_v54 = vmul.f32 %v839_v51, %v825_v49 }
 0x68b   :  { %v842_v48 = vpack.c.bf16 %v841_v54, %v840_v52 }
 0x68d   :  { %1898 = vmatmul.msk.bf16.vlgmr.msrb.gmra.mxu1 %vm876_vm1, %v842_v48 }
 0x70a   :  { %v889_v63 = vpop.f32.mrf.mxu1 }
 0x70b   :  { %v890_v0 = vadd.f32 %v889_v63, %v851_v62 }
 0x70d   :  { %v894_v2 = vadd.f32 %v890_v0, %v787_v58 }
 0x70f   :  { %v896_v43 = vsel %vm33_vm0, %v894_v2, 0.0  ;;  %v902_v3 = vmul.f32 %v894_v2, %v894_v2 }
 0x710   :  { %897 = vadd.xlane.f32.xlu2 %v896_v43 }
 0x711   :  { %v904_v4 = vsel %vm33_vm0, %v902_v3, 0.0 }
 0x712   :  { %v891_v5 = vpop.f32.mrf.mxu1  ;;  %905 = vadd.xlane.f32.xlu1 %v904_v4 }
 0x713   :  { %v892_v7 = vadd.f32 %v891_v5, %v851_v62 }
 0x715   :  { %v895_v53 = vadd.f32 %v892_v7, %v788_v59 }
 0x717   :  { %v899_v61 = vsel %vm33_vm0, %v895_v53, 0.0  ;;  %v903_v9 = vmul.f32 %v895_v53, %v895_v53 }
 0x718   :  { %900 = vadd.xlane.f32.xlu0 %v899_v61 }
 0x719   :  { %v907_v10 = vsel %vm33_vm0, %v903_v9, 0.0 }
 0x71a   :  { %908 = vadd.xlane.f32.xlu2 %v907_v10 }
 0x783   :  { %v898_v11 = vpop.xlane.xlu2 %897 }
 0x784   :  { %v910_v12 = vmul.f32 0.03125, %v898_v11 }
 0x785   :  { %v906_v13 = vpop.xlane.xlu1 %905 }
 0x786   :  { %v914_v14 = vmul.f32 %v910_v12, %v910_v12  ;;  %v912_v15 = vmul.f32 0.03125, %v906_v13  ;;  %v918_v55 = vsub.f32 %v894_v2, %v910_v12 }
 0x788   :  { %v916_v1 = vsub.f32 %v912_v15, %v914_v14 }
 0x78a   :  { %v920_v18 = vadd.f32 1e-12, %v916_v1 }
 0x78b   :  { %v901_v19 = vpop.xlane.xlu0 %900 }
 0x78c   :  { %2133 = vrsqrt.f32 %v920_v18  ;;  %v911_v20 = vmul.f32 0.03125, %v901_v19  ;;  %vm928_vm3 = vweird.f32 %v920_v18 }
 0x78d   :  { %v909_v21 = vpop.xlane.xlu2 %908 }
 0x78e   :  { %v915_v22 = vmul.f32 %v911_v20, %v911_v20  ;;  %v913_v23 = vmul.f32 0.03125, %v909_v21  ;;  %v919_v38 = vsub.f32 %v895_v53, %v911_v20 }
 0x790   :  { %v917_v24 = vsub.f32 %v913_v23, %v915_v22 }
 0x792   :  { %v2134_v25 = vpop.eup %2133  ;;  %v921_v26 = vadd.f32 1e-12, %v917_v24 }
 0x793   :  { %v923_v58 = vmul.f32 %v2134_v25, %v920_v18  ;;  %vm929_vm2 = vweird.f32 %v2134_v25 }
 0x794   :  { %2135 = vrsqrt.f32 %v921_v26  ;;  %vm930_vm4 = vmor %vm928_vm3, %vm929_vm2  ;;  %vm938_vm6 = vweird.f32 %v921_v26 }
 0x795   :  { %v924_v59 = vmul.f32 %v2134_v25, %v923_v58 }
 0x797   :  { %v925_v27 = vmul.f32 0.5, %v924_v59 }
 0x799   :  { %v926_v28 = vsub.f32 1.5, %v925_v27 }
 0x79a   :  { %v2136_v29 = vpop.eup %2135 }
 0x79b   :  { %v927_v30 = vmul.f32 %v2134_v25, %v926_v28  ;;  %v933_v31 = vmul.f32 %v2136_v29, %v921_v26  ;;  %vm939_vm5 = vweird.f32 %v2136_v29 }
 0x79c   :  { %vm940_vm10 = vmor %vm938_vm6, %vm939_vm5  ;;  %vm1812_vm5 = vcmask 254976  }
 0x79d   :  { %v934_v32 = vmul.f32 %v2136_v29, %v933_v31  ;;  %v931_v33 = vsel %vm930_vm4, %v2134_v25, %v927_v30  ;;  %vm1809_vm4 = vcmask 1041409  }
 0x79e   :  { %v942_v36 = vmul.f32 %v931_v33, %v918_v55 }
 0x79f   :  { %v935_v34 = vmul.f32 0.5, %v934_v32 }
 0x7a0   :  { %v945_v40 = vmul.f32 %v944_v35, %v942_v36 }
 0x7a1   :  { %v936_v57 = vsub.f32 1.5, %v935_v34 }
 0x7a2   :  { %v2489_v56 = vadd.f32 %v947_v42, %v945_v40 }
 0x7a3   :  { %v937_v37 = vmul.f32 %v2136_v29, %v936_v57 }
 0x7a5   :  { %v941_v39 = vsel %vm940_vm10, %v2136_v29, %v937_v37 }
 0x7a6   :  { %v943_v41 = vmul.f32 %v941_v39, %v919_v38 }
 0x7a8   :  { %v946_v44 = vmul.f32 %v944_v35, %v943_v41 }
 0x7aa   :  { %v2491_v60 = vadd.f32 %v947_v42, %v946_v44 }
 0x7ac   :  { %v952_v45 = vpack.c.bf16 %v2491_v60, %v2489_v56 }
 0x7ae   :  { %1912 = vmatmul.msk.bf16.vlgmr.msra.gmra.mxu2 %vm33_vm0, %v952_v45 }
 0x831   :  { %v983_v49 = vpop.f32.mrf.mxu2 }
 0x832   :  { %v2502_v51 = vadd.f32 %v983_v49, %v958_v46 }
 0x834   :  { %998 = vrot.lane.b32.xlu2 %v2502_v51, %s2208_s13  ;;  %990 = vrot.lane.b32.xlu0 %v2502_v51, %s2209_s14 }
 0x839   :  { %v985_v50 = vpop.f32.mrf.mxu2 }
 0x83a   :  { %v2508_v52 = vadd.f32 %v985_v50, %v958_v46 }
 0x83c   :  { %992 = vrot.lane.b32.xlu1 %v2508_v52, %s2209_s14  ;;  %1002 = vrot.lane.b32.xlu2 %v2502_v51, %s2210_s15 }
 0x83d   :  { %1000 = vrot.lane.b32.xlu0 %v2508_v52, %s2208_s13 }
 0x844   :  { %994 = vrot.lane.b32.xlu1 %v2502_v51, %s2207_s12 }
 0x845   :  { %996 = vrot.lane.b32.xlu0 %v2508_v52, %s2207_s12 }
 0x88e   :  { %v2520_v54 = vpop.permute.xlu2 %998 }
 0x88f   :  { %1158 = vrot.lane.b32.xlu2 %v2520_v54, %s2210_s15 }
 0x896   :  { %v1003_v48 = vpop.permute.xlu2 %1002 }
 0x897   :  { %1913 = vmatpush.xpose.msk.msra.mxu3 %vm141_vm7, %v1003_v48 }
 0x89a   :  { %1914 = vmatmul.msk.f32.vlgmr.msra.gmra.mxu3 %vm141_vm7, %v2502_v51 }
 0x8a6   :  { %v2527_v62 = vpop.permute.xlu0 %990 }
 0x8a7   :  { %1054 = vrot.lane.b32.xlu1 %v2527_v62, %s2210_s15 }
 0x8ae   :  { %v2531_v63 = vpop.permute.xlu1 %992 }
 0x8af   :  { %v2533_v0 = vpop.permute.xlu0 %1000  ;;  %1080 = vrot.lane.b32.xlu0 %v2531_v63, %s2210_s15 }
 0x8b0   :  { %1184 = vrot.lane.b32.xlu1 %v2533_v0, %s2210_s15 }
 0x8b6   :  { %v2539_v2 = vpop.permute.xlu1 %994 }
 0x8b7   :  { %v2541_v43 = vpop.permute.xlu0 %996  ;;  %1106 = vrot.lane.b32.xlu2 %v2539_v2, %s2210_s15  ;;  %1028 = vrot.lane.b32.xlu0 %v2508_v52, %s2210_s15 }
 0x8b8   :  { %1132 = vrot.lane.b32.xlu1 %v2541_v43, %s2210_s15 }
 0x8e9   :  { %v1159_v4 = vpop.permute.xlu2 %1158 }
 0x911   :  { %v1107_v12 = vpop.permute.xlu2 %1106 }
 0x919   :  { %v1055_v3 = vpop.permute.xlu1 %1054 }
 0x91a   :  { %1917 = vmatpush.xpose.msk.msrb.mxu2 %vm141_vm7, %v1055_v3 }
 0x91d   :  { %v1025_v5 = vpop.f32.mrf.mxu3  ;;  %1918 = vmatmul.msk.f32.vlgmr.msrb.gmra.mxu2 %vm141_vm7, %v2527_v62 }
 0x91e   :  { %1925 = vmatpush.xpose.msk.msra.mxu2 %vm141_vm7, %v1159_v4  ;;  %v1210_v7 = vmul.f32 0.35355338, %v1025_v5 }
 0x920   :  { %v1218_v53 = vadd.f32 %v2364_v8, %v1210_v7 }
 0x921   :  { %v1081_v61 = vpop.permute.xlu0 %1080 }
 0x922   :  { %v1185_v9 = vpop.permute.xlu1 %1184  ;;  %1919 = vmatpush.xpose.msk.msrb.mxu3 %vm141_vm7, %v1081_v61  ;;  %v1226_v10 = vsel %vm141_vm7, %v1218_v53, -inf }
 0x923   :  { %1227 = vmax.xlane.f32.xlu1 %v1226_v10 }
 0x925   :  { %1920 = vmatmul.msk.f32.vlgmr.msrb.gmra.mxu3 %vm141_vm7, %v2531_v63  ;;  %1926 = vmatmul.msk.f32.vlgmr.msra.gmra.mxu2 %vm141_vm7, %v2520_v54 }
 0x926   :  { %1927 = vmatpush.xpose.msk.msra.mxu3 %vm141_vm7, %v1185_v9 }
 0x929   :  { %v1029_v11 = vpop.permute.xlu0 %1028 }
 0x92a   :  { %v1133_v13 = vpop.permute.xlu1 %1132  ;;  %1915 = vmatpush.xpose.msk.msra.mxu0 %vm141_vm7, %v1029_v11 }
 0x92b   :  { %1923 = vmatpush.xpose.msk.msra.mxu1 %vm141_vm7, %v1133_v13 }
 0x92d   :  { %1916 = vmatmul.msk.f32.vlgmr.msra.gmra.mxu0 %vm141_vm7, %v2508_v52  ;;  %1928 = vmatmul.msk.f32.vlgmr.msra.gmra.mxu3 %vm141_vm7, %v2533_v0 }
 0x92e   :  { %1921 = vmatpush.xpose.msk.msrb.mxu0 %vm141_vm7, %v1107_v12  ;;  %1924 = vmatmul.msk.f32.vlgmr.msra.gmra.mxu1 %vm141_vm7, %v2541_v43 }
 0x935   :  { %1922 = vmatmul.msk.f32.vlgmr.msrb.gmra.mxu0 %vm141_vm7, %v2539_v2 }
 0x996   :  { %v1228_v26 = vpop.xlane.xlu1 %1227 }
 0x997   :  { %v1250_v28 = vsub.f32 %v1218_v53, %v1228_v26 }
 0x999   :  { %v1258_v33 = vmul.f32 1.442695, %v1250_v28 }
 0x99b   :  { %2137 = vpow2.f32 %v1258_v33 }
 0x9a0   :  { %v1077_v15 = vpop.f32.mrf.mxu2 }
 0x9a1   :  { %v1212_v29 = vmul.f32 0.35355338, %v1077_v15  ;;  %v2584_v36 = vpop.eup %2137 }
 0x9a2   :  { %v1274_v37 = vsel %vm141_vm7, %v2584_v36, 0.0 }
 0x9a3   :  { %v1220_v34 = vadd.f32 %v2364_v8, %v1212_v29 }
 0x9a5   :  { %v1232_v57 = vsel %vm141_vm7, %v1220_v34, -inf }
 0x9a8   :  { %v1103_v18 = vpop.f32.mrf.mxu3  ;;  %v1181_v59 = vpop.f32.mrf.mxu2 }
 0x9a9   :  { %v1213_v22 = vmul.f32 0.35355338, %v1103_v18  ;;  %v1216_v31 = vmul.f32 0.35355338, %v1181_v59  ;;  %v2052_v18 = vpack.i.bf16 %v2531_v63, %v2527_v62 }
 0x9aa   :  { %v1051_v14 = vpop.f32.mrf.mxu0 }
 0x9ab   :  { %v1211_v16 = vmul.f32 0.35355338, %v1051_v14  ;;  %v1155_v1 = vpop.f32.mrf.mxu1  ;;  %v1221_v58 = vadd.f32 %v2359_v6, %v1213_v22  ;;  %v1224_v55 = vadd.f32 %v2364_v8, %v1216_v31 }
 0x9ac   :  { %v1215_v17 = vmul.f32 0.35355338, %v1155_v1 }
 0x9ad   :  { %v1219_v19 = vadd.f32 %v2359_v6, %v1211_v16  ;;  %v1235_v32 = vsel %vm141_vm7, %v1221_v58, -inf  ;;  %v1244_v35 = vsel %vm141_vm7, %v1224_v55, -inf }
 0x9ae   :  { %v1223_v20 = vadd.f32 %v2359_v6, %v1215_v17 }
 0x9af   :  { %v1229_v21 = vsel %vm141_vm7, %v1219_v19, -inf }
 0x9b0   :  { %v1241_v23 = vsel %vm141_vm7, %v1223_v20, -inf  ;;  %1230 = vmax.xlane.f32.xlu0 %v1229_v21  ;;  %v1207_v45 = vpop.f32.mrf.mxu3 }
 0x9b1   :  { %1242 = vmax.xlane.f32.xlu2 %v1241_v23  ;;  %v1217_v5 = vmul.f32 0.35355338, %v1207_v45 }
 0x9b2   :  { %v1129_v24 = vpop.f32.mrf.mxu0 }
 0x9b3   :  { %v1214_v25 = vmul.f32 0.35355338, %v1129_v24  ;;  %v1225_v9 = vadd.f32 %v2359_v6, %v1217_v5 }
 0x9b5   :  { %v1222_v27 = vadd.f32 %v2364_v8, %v1214_v25  ;;  %v1247_v13 = vsel %vm141_vm7, %v1225_v9, -inf  ;;  %v2067_v25 = vpack.i.bf16 %v2541_v43, %v2539_v2 }
 0x9b7   :  { %v1238_v30 = vsel %vm141_vm7, %v1222_v27, -inf }
 0x9b8   :  { %1239 = vmax.xlane.f32.xlu0 %v1238_v30 }
 0x9b9   :  { %1236 = vmax.xlane.f32.xlu2 %v1235_v32 }
 0x9c0   :  { %1233 = vmax.xlane.f32.xlu0 %v1232_v57 }
 0x9c1   :  { %1245 = vmax.xlane.f32.xlu2 %v1244_v35 }
 0x9c9   :  { %1275 = vadd.xlane.f32.xlu2 %v1274_v37 }
 0xa23   :  { %v1231_v38 = vpop.xlane.xlu0 %1230 }
 0xa24   :  { %v1243_v39 = vpop.xlane.xlu2 %1242  ;;  %v1251_v40 = vsub.f32 %v1219_v19, %v1231_v38  ;;  %v2057_v19 = vpack.i.bf16 %v2508_v52, %v2502_v51 }
 0xa25   :  { %v1255_v41 = vsub.f32 %v1223_v20, %v1243_v39 }
 0xa26   :  { %v1260_v42 = vmul.f32 1.442695, %v1251_v40 }
 0xa27   :  { %v1268_v44 = vmul.f32 1.442695, %v1255_v41 }
 0xa28   :  { %2139 = vpow2.f32 %v1260_v42 }
 0xa29   :  { %2141 = vpow2.f32 %v1268_v44 }
 0xa2b   :  { %v1240_v8 = vpop.xlane.xlu0 %1239 }
 0xa2c   :  { %v1237_v46 = vpop.xlane.xlu2 %1236  ;;  %v1254_v49 = vsub.f32 %v1222_v27, %v1240_v8 }
 0xa2d   :  { %v1253_v48 = vsub.f32 %v1221_v58, %v1237_v46 }
 0xa2e   :  { %v2588_v50 = vpop.eup %2139  ;;  %v1266_v3 = vmul.f32 1.442695, %v1254_v49 }
 0xa2f   :  { %v2590_v4 = vpop.eup %2141  ;;  %v1277_v7 = vsel %vm141_vm7, %v2588_v50, 0.0  ;;  %v1264_v61 = vmul.f32 1.442695, %v1253_v48 }
 0xa30   :  { %2143 = vpow2.f32 %v1266_v3  ;;  %v1289_v53 = vsel %vm141_vm7, %v2590_v4, 0.0  ;;  %1278 = vadd.xlane.f32.xlu1 %v1277_v7 }
 0xa31   :  { %1290 = vadd.xlane.f32.xlu2 %v1289_v53  ;;  %2145 = vpow2.f32 %v1264_v61 }
 0xa33   :  { %v1234_v20 = vpop.xlane.xlu0 %1233 }
 0xa34   :  { %v1246_v10 = vpop.xlane.xlu2 %1245  ;;  %v1252_v21 = vsub.f32 %v1220_v34, %v1234_v20 }
 0xa35   :  { %v1256_v12 = vsub.f32 %v1224_v55, %v1246_v10  ;;  %v2062_v55 = vpack.i.bf16 %v2533_v0, %v2520_v54 }
 0xa36   :  { %v2597_v11 = vpop.eup %2143  ;;  %v1262_v22 = vmul.f32 1.442695, %v1252_v21 }
 0xa37   :  { %v1286_v14 = vsel %vm141_vm7, %v2597_v11, 0.0  ;;  %v1270_v15 = vmul.f32 1.442695, %v1256_v12  ;;  %v2146_v16 = vpop.eup %2145 }
 0xa38   :  { %1248 = vmax.xlane.f32.xlu1 %v1247_v13  ;;  %1287 = vadd.xlane.f32.xlu0 %v1286_v14  ;;  %v1283_v1 = vsel %vm141_vm7, %v2146_v16, 0.0 }
 0xa39   :  { %2147 = vpow2.f32 %v1270_v15 }
 0xa3a   :  { %2149 = vpow2.f32 %v1262_v22 }
 0xa3c   :  { %v1276_v29 = vpop.xlane.xlu2 %1275 }
 0xa3f   :  { %v2603_v17 = vpop.eup %2147 }
 0xa40   :  { %1284 = vadd.xlane.f32.xlu0 %v1283_v1  ;;  %v1292_v6 = vsel %vm141_vm7, %v2603_v17, 0.0  ;;  %v2150_v23 = vpop.eup %2149 }
 0xa41   :  { %v1280_v24 = vsel %vm141_vm7, %v2150_v23, 0.0 }
 0xa48   :  { %1293 = vadd.xlane.f32.xlu0 %v1292_v6 }
 0xa51   :  { %2053 = vrot.lane.b32.xlu1 %v2052_v18, %s2211_s1  ;;  %v2001_v18 = vld [vmem:[%s2694_s4 + $0x18] sm:$0xff] }
 0xa5c   :  { %2058 = vrot.lane.b32.xlu0 %v2057_v19, %s2211_s1  ;;  %v2000_v19 = vld [vmem:[%s2694_s4 + $0x10] sm:$0xff] }
 0xa7b   :  { %1281 = vadd.xlane.f32.xlu1 %v1280_v24 }
 0xa94   :  { %2068 = vrot.lane.b32.xlu1 %v2067_v25, %s2211_s1 }
 0xaa3   :  { %v1279_v62 = vpop.xlane.xlu1 %1278 }
 0xaa4   :  { %v1291_v54 = vpop.xlane.xlu2 %1290 }
 0xaab   :  { %v1249_v63 = vpop.xlane.xlu1 %1248  ;;  %v1288_v51 = vpop.xlane.xlu0 %1287 }
 0xaac   :  { %v1257_v26 = vsub.f32 %v1225_v9, %v1249_v63 }
 0xaae   :  { %v1272_v58 = vmul.f32 1.442695, %v1257_v26 }
 0xab0   :  { %2151 = vpow2.f32 %v1272_v58 }
 0xab3   :  { %v1285_v27 = vpop.xlane.xlu0 %1284 }
 0xab4   :  { %2153 = vrcp.f32 %v1285_v27 }
 0xab5   :  { %2155 = vrcp.f32 %v1276_v29 }
 0xab6   :  { %v2152_v52 = vpop.eup %2151  ;;  %2157 = vrcp.f32 %v1279_v62 }
 0xab7   :  { %v1295_v59 = vsel %vm141_vm7, %v2152_v52, 0.0 }
 0xab8   :  { %1296 = vadd.xlane.f32.xlu2 %v1295_v59 }
 0xaba   :  { %v2154_v28 = vpop.eup %2153 }
 0xabb   :  { %v1309_v2 = vmul.f32 %v2154_v28, %v2146_v16  ;;  %v1294_v43 = vpop.xlane.xlu0 %1293  ;;  %v2156_v33 = vpop.eup %2155 }
 0xabc   :  { %v2158_v34 = vpop.eup %2157  ;;  %v1306_v38 = vmul.f32 %v2156_v33, %v2584_v36 }
 0xabd   :  { %v1307_v39 = vmul.f32 %v2158_v34, %v2588_v50 }
 0xac3   :  { %v2054_v30 = vpop.permute.xlu1 %2053 }
 0xac4   :  { %v2056_v31 = vunpack.i.h.bf16 %v2054_v30  ;;  %v2055_v32 = vunpack.i.l.bf16 %v2054_v30  ;;  %v1558_v30 = vperm.slane %v2499_v47, 1 }
 0xac6   :  { %1387 = vmatpush.msrb.mxu2 %v2055_v32  ;;  %1413 = vmatpush.msrb.mxu3 %v2056_v31 }
 0xac7   :  { %1932 = vmatmul.msk.f32.vlgmr.msrb.gmra.mxu3 %vm141_vm7, %v1309_v2 }
 0xace   :  { %v2059_v57 = vpop.permute.xlu0 %2058 }
 0xacf   :  { %v2061_v35 = vunpack.i.h.bf16 %v2059_v57  ;;  %v2060_v37 = vunpack.i.l.bf16 %v2059_v57 }
 0xad0   :  { %2063 = vrot.lane.b32.xlu2 %v2062_v55, %s2211_s1 }
 0xad1   :  { %1335 = vmatpush.msra.mxu0 %v2060_v37  ;;  %1361 = vmatpush.msrb.mxu1 %v2061_v35 }
 0xad2   :  { %1929 = vmatmul.msk.f32.vlgmr.msra.gmra.mxu0 %vm141_vm7, %v1306_v38  ;;  %1930 = vmatmul.msk.f32.vlgmr.msrb.gmra.mxu1 %vm141_vm7, %v1307_v39 }
 0xaee   :  { %v1282_v40 = vpop.xlane.xlu1 %1281 }
 0xaef   :  { %2159 = vrcp.f32 %v1282_v40 }
 0xaf0   :  { %2161 = vrcp.f32 %v1291_v54 }
 0xaf1   :  { %2163 = vrcp.f32 %v1288_v51 }
 0xaf2   :  { %2165 = vrcp.f32 %v1294_v43 }
 0xaf5   :  { %v2160_v41 = vpop.eup %2159 }
 0xaf6   :  { %v1308_v42 = vmul.f32 %v2160_v41, %v2150_v23  ;;  %v2162_v0 = vpop.eup %2161 }
 0xaf7   :  { %v2164_v36 = vpop.eup %2163  ;;  %v1311_v46 = vmul.f32 %v2162_v0, %v2590_v4  ;;  %v2003_v0 = vld [vmem:[%s2695_s5 + $0x18] sm:$0xff] }
 0xaf8   :  { %1931 = vmatmul.msk.f32.vlgmr.msrb.gmra.mxu2 %vm141_vm7, %v1308_v42  ;;  %v1310_v49 = vmul.f32 %v2164_v36, %v2597_v11  ;;  %v2166_v48 = vpop.eup %2165 }
 0xaf9   :  { %v1312_v61 = vmul.f32 %v2166_v48, %v2603_v17 }
 0xb06   :  { %v2069_v44 = vpop.permute.xlu1 %2068 }
 0xb07   :  { %v2071_v8 = vunpack.i.h.bf16 %v2069_v44  ;;  %v2070_v45 = vunpack.i.l.bf16 %v2069_v44 }
 0xb09   :  { %1439 = vmatpush.msrb.mxu0 %v2070_v45  ;;  %1465 = vmatpush.msra.mxu1 %v2071_v8 }
 0xb0a   :  { %1933 = vmatmul.msk.f32.vlgmr.msrb.gmra.mxu0 %vm141_vm7, %v1310_v49  ;;  %1934 = vmatmul.msk.f32.vlgmr.msra.gmra.mxu1 %vm141_vm7, %v1311_v46 }
 0xb0b   :  { %1580 = vmatpush.bf16.msra.mxu0 %v2001_v18  ;;  %1672 = vmatpush.bf16.msrb.mxu1 %v2003_v0 }
 0xb0f   :  { %1581 = vmatpush.bf16.msra.mxu0 %v2000_v19 }
 0xb2b   :  { %v1297_v50 = vpop.xlane.xlu2 %1296 }
 0xb2c   :  { %2167 = vrcp.f32 %v1297_v50 }
 0xb32   :  { %v2168_v3 = vpop.eup %2167 }
 0xb33   :  { %v2064_v5 = vpop.permute.xlu2 %2063  ;;  %v1313_v9 = vmul.f32 %v2168_v3, %v2152_v52 }
 0xb34   :  { %v2066_v7 = vunpack.i.h.bf16 %v2064_v5  ;;  %v2065_v53 = vunpack.i.l.bf16 %v2064_v5 }
 0xb36   :  { %1491 = vmatpush.msra.mxu2 %v2065_v53  ;;  %1517 = vmatpush.msra.mxu3 %v2066_v7 }
 0xb37   :  { %1935 = vmatmul.msk.f32.vlgmr.msra.gmra.mxu2 %vm141_vm7, %v1312_v61  ;;  %1936 = vmatmul.msk.f32.vlgmr.msra.gmra.mxu3 %vm141_vm7, %v1313_v9 }
 0xb4a   :  { %v1415_v4 = vpop.f32.mrf.mxu3 }
 0xb4f   :  { %v1337_v12 = vpop.f32.mrf.mxu0  ;;  %v1363_v13 = vpop.f32.mrf.mxu1 }
 0xb7b   :  { %v1389_v10 = vpop.f32.mrf.mxu2 }
 0xb7c   :  { %v2072_v11 = vpack.i.bf16 %v1415_v4, %v1389_v10 }
 0xb7e   :  { %2073 = vrot.lane.b32.xlu0 %v2072_v11, %s2212_s20 }
 0xb87   :  { %v1441_v14 = vpop.f32.mrf.mxu0  ;;  %v1467_v15 = vpop.f32.mrf.mxu1 }
 0xb88   :  { %v2077_v16 = vpack.i.bf16 %v1467_v15, %v1441_v14 }
 0xb8a   :  { %2078 = vrot.lane.b32.xlu1 %v2077_v16, %s2214_s22 }
 0xbba   :  { %v1493_v1 = vpop.f32.mrf.mxu2  ;;  %v1519_v17 = vpop.f32.mrf.mxu3 }
 0xbbb   :  { %v2082_v6 = vpack.i.bf16 %v1519_v17, %v1493_v1  ;;  %v1638_v1 = vperm.slane %v2499_v47, 2 }
 0xbbd   :  { %2083 = vrot.lane.b32.xlu2 %v2082_v6, %s2213_s21 }
 0xbf0   :  { %v2074_v20 = vpop.permute.xlu0 %2073 }
 0xbf1   :  { %v2076_v22 = vunpack.i.h.bf16 %v2074_v20  ;;  %v2075_v23 = vunpack.i.l.bf16 %v2074_v20 }
 0xbf3   :  { %v1546_v63 = vsel %vm141_vm7, %v1337_v12, %v2075_v23  ;;  %v1547_v26 = vsel %vm141_vm7, %v1363_v13, %v2076_v22  ;;  %v1641_v22 = vperm.slane %v2499_v47, 3 }
 0xbfc   :  { %v2079_v21 = vpop.permute.xlu1 %2078 }
 0xbfd   :  { %v2081_v24 = vunpack.i.h.bf16 %v2079_v21  ;;  %v2080_v25 = vunpack.i.l.bf16 %v2079_v21 }
 0xbff   :  { %v1549_v52 = vsel %vm692_vm8, %v1547_v26, %v2081_v24  ;;  %v1548_v59 = vsel %vm692_vm8, %v1546_v63, %v2080_v25  ;;  %v2007_v63 = vld [vmem:[%s2696_s6 + $0x38] sm:$0xff]  ;;  %v2006_v26 = vld [vmem:[%s2696_s6 + $0x30] sm:$0xff] }
 0xc00   :  { %1740 = vmatpush.bf16.msrb.mxu2 %v2007_v63 }
 0xc04   :  { %1741 = vmatpush.bf16.msrb.mxu2 %v2006_v26 }
 0xc17   :  { %v2084_v62 = vpop.permute.xlu2 %2083 }
 0xc18   :  { %v2086_v58 = vunpack.i.h.bf16 %v2084_v62  ;;  %v2085_v51 = vunpack.i.l.bf16 %v2084_v62 }
 0xc1a   :  { %v1550_v27 = vsel %vm695_vm9, %v1548_v59, %v2085_v51  ;;  %v1551_v28 = vsel %vm695_vm9, %v1549_v52, %v2086_v58  ;;  %v2005_v58 = vld [vmem:[%s2696_s6 + $0x28] sm:$0xff]  ;;  %v2004_v51 = vld [vmem:[%s2696_s6 + $0x20] sm:$0xff]  ;;  %v1650_v52 = vperm.slane %v2499_v47, 4  ;;  %s2215_s6 = smov [#allocation2]  }
 0xc1b   :  { %v1552_v29 = vpack.c.bf16 %v1551_v28, %v1550_v27  ;;  %1742 = vmatpush.bf16.msrb.mxu2 %v2005_v58  ;;  %v1800_v58 = vperm.slane %v2499_v47, 6  ;;  %s1819_s8 = sshll.u32 %s2215_s6, 4  ;;  %s1820_s8 = int_to_ptr.vmem [resolvable:$true] %s1819_s8 }
 0xc1d   :  { %1949 = vmatmul.msk.bf16.vlgmr.msra.gmra.mxu0 %vm33_vm0, %v1552_v29 }
 0xc1f   :  { %1743 = vmatpush.bf16.msrb.mxu2 %v2004_v51 }
 0xc9a   :  { %v1583_v31 = vpop.f32.mrf.mxu0 }
 0xc9b   :  { %v1584_v32 = vadd.f32 %v1583_v31, %v1558_v30 }
 0xc9d   :  { %v1588_v2 = vadd.f32 %v1584_v32, %v2489_v56 }
 0xc9f   :  { %v1590_v43 = vsel %vm33_vm0, %v1588_v2, 0.0  ;;  %v1596_v33 = vmul.f32 %v1588_v2, %v1588_v2 }
 0xca0   :  { %1591 = vadd.xlane.f32.xlu0 %v1590_v43 }
 0xca1   :  { %v1598_v34 = vsel %vm33_vm0, %v1596_v33, 0.0 }
 0xca2   :  { %v1585_v55 = vpop.f32.mrf.mxu0  ;;  %1599 = vadd.xlane.f32.xlu2 %v1598_v34 }
 0xca3   :  { %v1586_v57 = vadd.f32 %v1585_v55, %v1558_v30 }
 0xca5   :  { %v1589_v35 = vadd.f32 %v1586_v57, %v2491_v60  ;;  %v2002_v60 = vld [vmem:[%s2695_s5 + $0x10] sm:$0xff] }
 0xca6   :  { %1673 = vmatpush.bf16.msrb.mxu1 %v2002_v60 }
 0xca7   :  { %v1593_v37 = vsel %vm33_vm0, %v1589_v35, 0.0  ;;  %v1597_v38 = vmul.f32 %v1589_v35, %v1589_v35 }
 0xca8   :  { %1594 = vadd.xlane.f32.xlu1 %v1593_v37 }
 0xca9   :  { %v1601_v39 = vsel %vm33_vm0, %v1597_v38, 0.0 }
 0xcaa   :  { %1602 = vadd.xlane.f32.xlu0 %v1601_v39 }
 0xd13   :  { %v1592_v40 = vpop.xlane.xlu0 %1591 }
 0xd14   :  { %v1604_v56 = vmul.f32 0.03125, %v1592_v40 }
 0xd15   :  { %v1600_v41 = vpop.xlane.xlu2 %1599 }
 0xd16   :  { %v1608_v42 = vmul.f32 %v1604_v56, %v1604_v56  ;;  %v1606_v54 = vmul.f32 0.03125, %v1600_v41  ;;  %v1612_v15 = vsub.f32 %v1588_v2, %v1604_v56 }
 0xd18   :  { %v1610_v36 = vsub.f32 %v1606_v54, %v1608_v42 }
 0xd1a   :  { %v1614_v44 = vadd.f32 1e-12, %v1610_v36  ;;  %v1708_v36 = vperm.slane %v2499_v47, 5 }
 0xd1b   :  { %v1595_v8 = vpop.xlane.xlu1 %1594 }
 0xd1c   :  { %2169 = vrsqrt.f32 %v1614_v44  ;;  %v1605_v45 = vmul.f32 0.03125, %v1595_v8  ;;  %vm1622_vm8 = vweird.f32 %v1614_v44 }
 0xd1d   :  { %v1603_v46 = vpop.xlane.xlu0 %1602 }
 0xd1e   :  { %v1609_v49 = vmul.f32 %v1605_v45, %v1605_v45  ;;  %v1607_v50 = vmul.f32 0.03125, %v1603_v46  ;;  %v1613_v18 = vsub.f32 %v1589_v35, %v1605_v45 }
 0xd20   :  { %v1611_v48 = vsub.f32 %v1607_v50, %v1609_v49 }
 0xd22   :  { %v2170_v3 = vpop.eup %2169  ;;  %v1615_v5 = vadd.f32 1e-12, %v1611_v48 }
 0xd23   :  { %v1617_v7 = vmul.f32 %v2170_v3, %v1614_v44  ;;  %vm1623_vm7 = vweird.f32 %v2170_v3 }
 0xd24   :  { %2171 = vrsqrt.f32 %v1615_v5  ;;  %vm1624_vm9 = vmor %vm1622_vm8, %vm1623_vm7  ;;  %vm1632_vm12 = vweird.f32 %v1615_v5 }
 0xd25   :  { %v1618_v53 = vmul.f32 %v2170_v3, %v1617_v7 }
 0xd27   :  { %v1619_v61 = vmul.f32 0.5, %v1618_v53 }
 0xd29   :  { %v1620_v9 = vsub.f32 1.5, %v1619_v61 }
 0xd2a   :  { %v2172_v4 = vpop.eup %2171 }
 0xd2b   :  { %v1621_v10 = vmul.f32 %v2170_v3, %v1620_v9  ;;  %v1627_v11 = vmul.f32 %v2172_v4, %v1615_v5  ;;  %vm1633_vm11 = vweird.f32 %v2172_v4 }
 0xd2c   :  { %vm1634_vm13 = vmor %vm1632_vm12, %vm1633_vm11 }
 0xd2d   :  { %v1628_v12 = vmul.f32 %v2172_v4, %v1627_v11  ;;  %v1625_v13 = vsel %vm1624_vm9, %v2170_v3, %v1621_v10 }
 0xd2e   :  { %v1636_v17 = vmul.f32 %v1625_v13, %v1612_v15 }
 0xd2f   :  { %v1629_v14 = vmul.f32 0.5, %v1628_v12 }
 0xd30   :  { %v1639_v20 = vmul.f32 %v1638_v1, %v1636_v17 }
 0xd31   :  { %v1630_v16 = vsub.f32 1.5, %v1629_v14 }
 0xd32   :  { %v1642_v24 = vadd.f32 %v1641_v22, %v1639_v20 }
 0xd33   :  { %v1631_v6 = vmul.f32 %v2172_v4, %v1630_v16 }
 0xd35   :  { %v1635_v19 = vsel %vm1634_vm13, %v2172_v4, %v1631_v6 }
 0xd36   :  { %v1637_v21 = vmul.f32 %v1635_v19, %v1613_v18 }
 0xd38   :  { %v1640_v23 = vmul.f32 %v1638_v1, %v1637_v21 }
 0xd3a   :  { %v1643_v25 = vadd.f32 %v1641_v22, %v1640_v23 }
 0xd3c   :  { %v1644_v62 = vpack.c.bf16 %v1643_v25, %v1642_v24 }
 0xd3e   :  { %1962 = vmatmul.msk.bf16.vlgmr.msrb.gmra.mxu1 %vm33_vm0, %v1644_v62 }
 0xdbb   :  { %v1675_v59 = vpop.f32.mrf.mxu1 }
 0xdbc   :  { %v1676_v27 = vadd.f32 %v1675_v59, %v1650_v52 }
 0xdbe   :  { %v1682_v28 = vmul.f32 0.044715, %v1676_v27  ;;  %v1680_v40 = vmul.f32 0.5, %v1676_v27 }
 0xdc0   :  { %v1684_v29 = vmul.f32 %v1682_v28, %v1676_v27 }
 0xdc2   :  { %v1686_v30 = vmul.f32 %v1684_v29, %v1676_v27  ;;  %v1803_v29 = vperm.slane %v2499_v47, 7 }
 0xdc3   :  { %v1677_v31 = vpop.f32.mrf.mxu1 }
 0xdc4   :  { %v1688_v32 = vadd.f32 %v1686_v30, %v1676_v27  ;;  %v1678_v2 = vadd.f32 %v1677_v31, %v1650_v52 }
 0xdc6   :  { %v1683_v43 = vmul.f32 0.044715, %v1678_v2  ;;  %v1690_v33 = vmul.f32 0.7978846, %v1688_v32  ;;  %v1681_v56 = vmul.f32 0.5, %v1678_v2 }
 0xdc8   :  { %v1685_v34 = vmul.f32 %v1683_v43, %v1678_v2  ;;  %2173 = vtanh.f32 %v1690_v33 }
 0xdca   :  { %v1687_v55 = vmul.f32 %v1685_v34, %v1678_v2 }
 0xdcc   :  { %v1689_v57 = vadd.f32 %v1687_v55, %v1678_v2 }
 0xdce   :  { %v1691_v35 = vmul.f32 0.7978846, %v1689_v57  ;;  %v2174_v37 = vpop.eup %2173 }
 0xdcf   :  { %v1694_v38 = vadd.f32 1.0, %v2174_v37 }
 0xdd0   :  { %2175 = vtanh.f32 %v1691_v35 }
 0xdd1   :  { %v1696_v42 = vmul.f32 %v1694_v38, %v1680_v40 }
 0xdd6   :  { %v2176_v39 = vpop.eup %2175 }
 0xdd7   :  { %v1695_v41 = vadd.f32 1.0, %v2176_v39 }
 0xdd9   :  { %v1697_v54 = vmul.f32 %v1695_v41, %v1681_v56 }
 0xddb   :  { %v1698_v0 = vpack.c.bf16 %v1697_v54, %v1696_v42 }
 0xddd   :  { %1987 = vmatmul.msk.bf16.vlgmr.msrb.gmra.mxu2 %vm876_vm1, %v1698_v0 }
 0xe60   :  { %v1745_v60 = vpop.f32.mrf.mxu2 }
 0xe61   :  { %v1746_v44 = vadd.f32 %v1745_v60, %v1708_v36 }
 0xe63   :  { %v1750_v8 = vadd.f32 %v1746_v44, %v1642_v24 }
 0xe65   :  { %v1752_v45 = vsel %vm33_vm0, %v1750_v8, 0.0  ;;  %v1758_v7 = vmul.f32 %v1750_v8, %v1750_v8 }
 0xe66   :  { %1753 = vadd.xlane.f32.xlu2 %v1752_v45 }
 0xe67   :  { %v1760_v53 = vsel %vm33_vm0, %v1758_v7, 0.0 }
 0xe68   :  { %v1747_v46 = vpop.f32.mrf.mxu2 }
 0xe69   :  { %v1748_v49 = vadd.f32 %v1747_v46, %v1708_v36 }
 0xe6b   :  { %v1751_v50 = vadd.f32 %v1748_v49, %v1643_v25 }
 0xe6d   :  { %v1755_v48 = vsel %vm33_vm0, %v1751_v50, 0.0  ;;  %v1759_v3 = vmul.f32 %v1751_v50, %v1751_v50 }
 0xe6e   :  { %1756 = vadd.xlane.f32.xlu1 %v1755_v48 }
 0xe6f   :  { %v1763_v5 = vsel %vm33_vm0, %v1759_v3, 0.0 }
 0xe70   :  { %1764 = vadd.xlane.f32.xlu0 %v1763_v5 }
 0xe76   :  { %1761 = vadd.xlane.f32.xlu1 %v1760_v53 }
 0xed9   :  { %v1754_v4 = vpop.xlane.xlu2 %1753 }
 0xeda   :  { %v1766_v13 = vmul.f32 0.03125, %v1754_v4 }
 0xedc   :  { %v1770_v1 = vmul.f32 %v1766_v13, %v1766_v13  ;;  %v1774_v31 = vsub.f32 %v1750_v8, %v1766_v13 }
 0xee1   :  { %v1757_v61 = vpop.xlane.xlu1 %1756 }
 0xee2   :  { %v1767_v9 = vmul.f32 0.03125, %v1757_v61 }
 0xee3   :  { %v1765_v10 = vpop.xlane.xlu0 %1764 }
 0xee4   :  { %v1771_v11 = vmul.f32 %v1767_v9, %v1767_v9  ;;  %v1769_v12 = vmul.f32 0.03125, %v1765_v10  ;;  %v1775_v26 = vsub.f32 %v1751_v50, %v1767_v9 }
 0xee6   :  { %v1773_v14 = vsub.f32 %v1769_v12, %v1771_v11 }
 0xee8   :  { %v1777_v15 = vadd.f32 1e-12, %v1773_v14 }
 0xee9   :  { %v1762_v16 = vpop.xlane.xlu1 %1761 }
 0xeea   :  { %2177 = vrsqrt.f32 %v1777_v15  ;;  %v1768_v17 = vmul.f32 0.03125, %v1762_v16  ;;  %vm1794_vm14 = vweird.f32 %v1777_v15 }
 0xeec   :  { %v1772_v6 = vsub.f32 %v1768_v17, %v1770_v1 }
 0xeee   :  { %v1776_v18 = vadd.f32 1e-12, %v1772_v6 }
 0xef0   :  { %v2178_v19 = vpop.eup %2177  ;;  %2179 = vrsqrt.f32 %v1776_v18  ;;  %vm1784_vm2 = vweird.f32 %v1776_v18 }
 0xef1   :  { %v1789_v20 = vmul.f32 %v2178_v19, %v1777_v15  ;;  %vm1795_vm0 = vweird.f32 %v2178_v19 }
 0xef2   :  { %vm1796_vm15 = vmor %vm1794_vm14, %vm1795_vm0 }
 0xef3   :  { %v1790_v21 = vmul.f32 %v2178_v19, %v1789_v20 }
 0xef5   :  { %v1791_v22 = vmul.f32 0.5, %v1790_v21 }
 0xef6   :  { %v2180_v23 = vpop.eup %2179 }
 0xef7   :  { %v1792_v24 = vsub.f32 1.5, %v1791_v22  ;;  %v1779_v25 = vmul.f32 %v2180_v23, %v1776_v18  ;;  %vm1785_vm1 = vweird.f32 %v2180_v23 }
 0xef8   :  { %vm1786_vm3 = vmor %vm1784_vm2, %vm1785_vm1 }
 0xef9   :  { %v1793_v62 = vmul.f32 %v2178_v19, %v1792_v24  ;;  %v1780_v63 = vmul.f32 %v2180_v23, %v1779_v25 }
 0xefb   :  { %v1797_v51 = vsel %vm1796_vm15, %v2178_v19, %v1793_v62  ;;  %v1781_v52 = vmul.f32 0.5, %v1780_v63 }
 0xefc   :  { %v1799_v59 = vmul.f32 %v1797_v51, %v1775_v26 }
 0xefd   :  { %v1782_v27 = vsub.f32 1.5, %v1781_v52 }
 0xefe   :  { %v1802_v28 = vmul.f32 %v1800_v58, %v1799_v59 }
 0xeff   :  { %v1783_v30 = vmul.f32 %v2180_v23, %v1782_v27 }
 0xf00   :  { %v1805_v43 = vadd.f32 %v1803_v29, %v1802_v28 }
 0xf01   :  { %v1787_v32 = vsel %vm1786_vm3, %v2180_v23, %v1783_v30 }
 0xf02   :  { %v1798_v2 = vmul.f32 %v1787_v32, %v1774_v31  ;;  %v1808_v55 = vrot.slane %v1805_v43, 7 }
 0xf04   :  { %v1801_v33 = vmul.f32 %v1800_v58, %v1798_v2 }
 0xf06   :  { %v1804_v34 = vadd.f32 %v1803_v29, %v1801_v33 }
 0xf08   :  { %v1810_v47 = vsel %vm1809_vm4, %v1808_v55, %v1804_v34 }
 0xf09   :  { %1813 = vst.msk [vmem:[#allocation2] sm:$0x3] %vm1812_vm5, %v1810_v47 }
 0xf0a   :  { %1824 = dma.vmem_to_hbm [thread:$0]  %s1820_s8, 32, %s1822_s11, [#allocation3]  }
 0xf0b   :  { %2205 = dma.done.wait [#allocation3], 32  }
 0xf0c   :  { %2206 = vsyncadd [#allocation3], 4294967264 }
 0xf0d   :  { %1829 = vsyncpa [#allocation3], 1 }

</bundles_post_ra>
